<compile_context>
chip_gen: v7x
topology: tpu7x:2x2x1
jax: 0.10.0
libtpu: 0.0.40
codegen_flags: <defaults>
</compile_context>

<pallas_src>
import numpy as np
import jax
import jax.numpy as jnp
from jax.experimental import pallas as pl
from jax.experimental.pallas import tpu as pltpu


def _round_up(x, m):
    return ((x + m - 1) // m) * m


def _next_pow2(n):
    p = 1
    while p < n:
        p *= 2
    return p


def _permuter_kernel(invlen_ref, pofl_ref, qp1_ref, s_ref, perm_ref, out_ref):
    """soft_rank (L2 projection onto the permutahedron of 1..N) + soft permutation.

    invlen_ref : (N, P)  f32 — 1/(k-j+1) where j <= k < N, else 0.0 (resident constant).
    pofl_ref   : (1, NN) i32 — p(L) = L // N for L < N*N, else -1    (resident constant).
    qp1_ref    : (1, NN) f32 — q(L) + 1 = (L % N) + 1                (resident constant).
    s_ref      : (TB, P) f32 — x[b]/eps sorted DESCENDING, zero-padded on lanes >= N.
    perm_ref   : (TB, N) i32 — perm[b, j] = original index of the j-th largest entry.
    out_ref    : (TB, NN) f32 — lane-flattened output row: out[b, p*N + q].
    """
    f32 = jnp.float32
    NEG = f32(-1e30)
    POS = f32(1e30)

    TB, P = s_ref.shape
    N = perm_ref.shape[1]

    inv_len = invlen_ref[...]                      # (N, P); 0.0 where invalid
    valid = inv_len > f32(0.0)                     # (N, P): j <= k < N

    lane = jax.lax.broadcasted_iota(jnp.int32, (1, P), 1)
    w = (N - lane).astype(f32)                     # permutahedron weights N..1
    s = s_ref[...]                                 # (TB, P)
    y = jnp.where(lane < N, s - w, f32(0.0))       # zero the padding lanes

    # When N + next_pow2(N) <= P + 1, the doubling scans below only ever pull
    # zero / NEG padding through their wrap-around lanes, so the per-step
    # wrap-mask selects are dead VALU work and are removed (review item).
    no_wrap = (N + _next_pow2(N)) <= (P + 1)

    # ---- inclusive prefix sum along lanes (Hillis-Steele doubling) ----
    csum = y
    sft = 1
    while sft < N:
        rolled = pltpu.roll(csum, sft, axis=1)     # rolled[k] = csum[(k - sft) % P]
        if no_wrap:
            csum = csum + rolled                   # wrapped lanes contribute exact zeros
        else:
            csum = csum + jnp.where(lane >= sft, rolled, f32(0.0))
        sft *= 2
    cprev = csum - y                               # sum_{m < k} y

    # ---- segment means A[b, j, k] = mean(y[b, j..k]) for j <= k < N, else NEG ----
    seg_sum = csum[:, None, :] - cprev[:, :N, None]            # (TB, N, P)
    A = jnp.where(valid[None, :, :], seg_sum * inv_len[None, :, :], NEG)

    # ---- suffix max along lanes: M[b, j, i] = max_{i <= k < N} A[b, j, k] ----
    M = A
    if not no_wrap:
        lane3 = jax.lax.broadcasted_iota(jnp.int32, (1, 1, P), 2)
    sft = 1
    while sft < N:
        rolled = pltpu.roll(M, P - sft, axis=2)    # rolled[i] = M[(i + sft) % P]
        if no_wrap:
            M = jnp.maximum(M, rolled)             # wraps only reach padding lanes
        else:
            M = jnp.maximum(M, jnp.where(lane3 < (P - sft), rolled, NEG))
        sft *= 2

    # ---- v[b, i] = min_{j <= i} M[b, j, i]  (exact non-increasing isotonic fit) ----
    v = jnp.min(jnp.where(valid[None, :, :], M, POS), axis=1)   # (TB, P)
    primal = s - v                                 # soft ranks in sorted order (lanes < N)

    # ---- un-sort + lane broadcast, fused (no MXU, no permuted (TB,N,P) slab):
    #      rank_flat[b, L] = ranks[b, L//N] = sum_j [perm[b,j] == L//N] * primal[b,j] ----
    p_of_l = pofl_ref[...][:, None, :]             # (1, 1, NN) i32
    cmp = perm_ref[...][:, :, None] == p_of_l      # (TB, N, NN)
    primal_j = primal[:, :N, None]                 # (TB, N, 1)
    rank_flat = jnp.sum(jnp.where(cmp, primal_j, f32(0.0)), axis=1)   # (TB, NN)

    # ---- out[b, p*N + q] = relu(1 - |rank[b, p] - (q + 1)|): lane-dense store ----
    out_ref[...] = jnp.maximum(f32(1.0) - jnp.abs(rank_flat - qp1_ref[...]), f32(0.0))


def _vmem_capacity_bytes():
    try:
        return int(pltpu.get_tpu_info().vmem_capacity_bytes)
    except Exception:
        return 64 * 1024 * 1024        # conservative default (v7x per-TC VMEM)


def _tpu_is_v7():
    try:
        kind = jax.devices()[0].device_kind.lower()
    except Exception:
        return False
    return ("v7" in kind) or ("7x" in kind)


def _choose_batch_tile(B, N, P, NN, n_cores, tile_budget_bytes):
    # Conservative per-row live-slab estimate: ~12 (N, P)-sized f32 intermediates
    # (A, M, roll temps, seg_sum, ...), the (N, NN) un-sort slab (x2 for the
    # compare), and the double-buffered flattened output row.
    per_row = (12 * N * P + 4 * N * NN + 8 * NN) * 4
    cap = max(1, tile_budget_bytes // per_row)
    want = pl.cdiv(B, 2 * max(1, n_cores))     # target >= 2 grid steps per core
    tb = max(1, min(B, cap, want))
    if B >= 8:
        tb = max(8, (tb // 8) * 8)             # keep the block's sublane dim 8-aligned
    else:
        tb = B                                 # tiny batch: single full-B tile
    return tb


def permuter_forward(x, eps):
    """Pallas implementation of permuter.forward (soft_rank with L2 regularization)."""
    B, N = x.shape
    P = _round_up(N, 128)          # lane-padded sorted/k axis
    NN = _round_up(N * N, 128)     # lane-flattened (p, q) output axis

    z = x.astype(jnp.float32) / jnp.float32(eps)
    # TODO(synk): lax.sort/argsort have no Mosaic lowering; the per-row descending
    # sort + argsort needed by soft_rank stays in plain JAX (glue), fused into a
    # single lax.sort(num_keys=1) so values and permutation share one sort pass.
    iota = jax.lax.broadcasted_iota(jnp.int32, z.shape, 1)
    neg_sorted, perm = jax.lax.sort((-z, iota), dimension=-1, num_keys=1)
    s_sorted = -neg_sorted
    s_pad = jnp.pad(s_sorted, ((0, 0), (0, P - N)))

    # Data-independent constants, hoisted out of the kernel body and kept
    # resident in VMEM (constant index_map across the grid).
    j_idx = np.arange(N)[:, None]
    k_idx = np.arange(P)[None, :]
    valid_np = (j_idx <= k_idx) & (k_idx < N)
    inv_len = jnp.asarray(
        np.where(valid_np, 1.0 / (k_idx - j_idx + 1.0), 0.0).astype(np.float32))
    l_idx = np.arange(NN)
    p_of_l = jnp.asarray(
        np.where(l_idx < N * N, l_idx // N, -1).astype(np.int32)[None, :])
    qp1 = jnp.asarray(((l_idx % N) + 1.0).astype(np.float32)[None, :])

    vmem_cap = _vmem_capacity_bytes()
    is_v7 = _tpu_is_v7()
    n_cores = 2 if is_v7 else 1
    tile_budget = (3 * vmem_cap) // 8          # ~24 MiB on v7x, ~48 MiB on v5e/v6e
    vmem_limit = (5 * vmem_cap) // 8           # ~40 MiB on v7x, ~80 MiB on v5e/v6e

    TB = _choose_batch_tile(B, N, P, NN, n_cores, tile_budget)
    num_tiles = pl.cdiv(B, TB)
    grid = (num_tiles,)

    # v7x: shard batch tiles across both TensorCores; elsewhere plain "parallel".
    batch_sem = "parallel"
    if is_v7 and num_tiles % n_cores == 0:
        batch_sem = getattr(pltpu, "CORE_PARALLEL", "parallel")

    log_n = max(1, int(np.ceil(np.log2(max(N, 2)))))
    cost = pl.CostEstimate(
        flops=int(B * (N * P * (3 * log_n + 6) + 3 * N * NN + 4 * NN)),
        transcendentals=0,
        bytes_accessed=int(4 * (B * P + B * N + N * P + 2 * NN + B * NN)),
    )

    def _call(sem):
        return pl.pallas_call(
            _permuter_kernel,
            out_shape=jax.ShapeDtypeStruct((B, NN), jnp.float32),
            grid=grid,
            in_specs=[
                pl.BlockSpec((N, P), lambda i: (0, 0)),     # inv_len (resident constant)
                pl.BlockSpec((1, NN), lambda i: (0, 0)),    # p(L)    (resident constant)
                pl.BlockSpec((1, NN), lambda i: (0, 0)),    # q(L)+1  (resident constant)
                pl.BlockSpec((TB, P), lambda i: (i, 0)),    # sorted, scaled scores
                pl.BlockSpec((TB, N), lambda i: (i, 0)),    # sort permutation
            ],
            out_specs=pl.BlockSpec((TB, NN), lambda i: (i, 0)),
            compiler_params=pltpu.CompilerParams(
                dimension_semantics=(sem,),
                vmem_limit_bytes=int(vmem_limit),
            ),
            cost_estimate=cost,
        )(inv_len, p_of_l, qp1, s_pad, perm)

    if batch_sem == "parallel":
        out_flat = _call("parallel")
    else:
        try:
            out_flat = _call(batch_sem)        # CORE_PARALLEL on v7x
        except Exception:
            out_flat = _call("parallel")       # safe fallback on older toolchains

    # TODO(synk): the module's debug print of ranks[0] is omitted to keep stdout clean.
    return out_flat[:, : N * N].reshape(B, N, N)


# ---------------- pure-numpy reference (PAV) for validation ----------------
def _pav_nonincreasing(y):
    vals, wts = [], []
    for v in y:
        vals.append(float(v))
        wts.append(1.0)
        while len(vals) > 1 and vals[-2] < vals[-1]:
            v2, w2 = vals.pop(), wts.pop()
            v1, w1 = vals.pop(), wts.pop()
            vals.append((v1 * w1 + v2 * w2) / (w1 + w2))
            wts.append(w1 + w2)
    out = []
    for v, w in zip(vals, wts):
        out.extend([v] * int(round(w)))
    return np.asarray(out)


def _reference(x, eps):
    x = np.asarray(x, np.float64)
    B, N = x.shape
    w = np.arange(N, 0, -1, dtype=np.float64)
    ranks = np.zeros((B, N))
    for b in range(B):
        z = x[b] / eps
        perm = np.argsort(-z)
        s = z[perm]
        v = _pav_nonincreasing(s - w)
        primal = s - v
        r = np.zeros(N)
        r[perm] = primal
        ranks[b] = r
    q = np.arange(1, N + 1, dtype=np.float64)
    return np.maximum(1.0 - np.abs(ranks[:, :, None] - q[None, None, :]), 0.0)


if __name__ == "__main__":
    B, N, EPS = 16, 16, 1.0          # input_size = 16, eps = 1.0
    key = jax.random.PRNGKey(0)
    x = jax.random.normal(key, (B, N), dtype=jnp.float32)

    out = jax.block_until_ready(permuter_forward(x, EPS))

    ref = _reference(np.asarray(x), EPS)
    assert out.shape == (B, N, N) and out.dtype == jnp.float32
    np.testing.assert_allclose(np.asarray(out), ref, rtol=1e-4, atol=1e-4)
    print("KERNEL_OK")
</pallas_src>

<mosaic_0001>
module attributes {stable_mosaic.version = 11 : i64} {
  func.func @_permuter_kernel(%arg0: i32, %arg1: memref<16x128xf32, #tpu.memory_space<vmem>>, %arg2: memref<1x256xi32, #tpu.memory_space<vmem>>, %arg3: memref<1x256xf32, #tpu.memory_space<vmem>>, %arg4: memref<8x128xf32, #tpu.memory_space<vmem>>, %arg5: memref<8x16xi32, #tpu.memory_space<vmem>>, %arg6: memref<8x256xf32, #tpu.memory_space<vmem>>) attributes {dimension_semantics = [#tpu.dimension_semantics<parallel>], iteration_bounds = array<i64: 2>, scalar_prefetch = 0 : i64, scratch_operands = 0 : i64, tpu.core_type = #tpu.core_type<tc>, window_params = [{pipeline_mode = #tpu.pipeline_mode<synchronous>, transform_indices = @transform_0, window_bounds = array<i64: 16, 128>}, {pipeline_mode = #tpu.pipeline_mode<synchronous>, transform_indices = @transform_1, window_bounds = array<i64: 1, 256>}, {pipeline_mode = #tpu.pipeline_mode<synchronous>, transform_indices = @transform_2, window_bounds = array<i64: 1, 256>}, {transform_indices = @transform_3, window_bounds = array<i64: 8, 128>}, {transform_indices = @transform_4, window_bounds = array<i64: 8, 16>}, {transform_indices = @transform_5, window_bounds = array<i64: 8, 256>}]} {
    %c0 = arith.constant 0 : index
    %c0_0 = arith.constant 0 : index
    %0 = vector.load %arg1[%c0, %c0_0] : memref<16x128xf32, #tpu.memory_space<vmem>>, vector<16x128xf32>
    %cst = arith.constant 0.000000e+00 : f32
    %1 = vector.broadcast %cst : f32 to vector<16x128xf32>
    %2 = arith.cmpf ogt, %0, %1 : vector<16x128xf32>
    %3 = tpu.iota {dimensions = array<i32: 1>} : vector<1x128xi32>
    %c16_i32 = arith.constant 16 : i32
    %4 = vector.broadcast %c16_i32 : i32 to vector<1x128xi32>
    %5 = arith.subi %4, %3 : vector<1x128xi32>
    %6 = arith.sitofp %5 : vector<1x128xi32> to vector<1x128xf32>
    %c0_1 = arith.constant 0 : index
    %c0_2 = arith.constant 0 : index
    %7 = vector.load %arg4[%c0_1, %c0_2] : memref<8x128xf32, #tpu.memory_space<vmem>>, vector<8x128xf32>
    %c16_i32_3 = arith.constant 16 : i32
    %8 = vector.broadcast %c16_i32_3 : i32 to vector<1x128xi32>
    %9 = arith.cmpi slt, %3, %8 : vector<1x128xi32>
    %10 = vector.broadcast %6 : vector<1x128xf32> to vector<8x128xf32>
    %11 = arith.subf %7, %10 : vector<8x128xf32>
    %cst_4 = arith.constant 0.000000e+00 : f32
    %12 = vector.shape_cast %9 : vector<1x128xi1> to vector<1x128xi1>
    %13 = vector.broadcast %12 : vector<1x128xi1> to vector<8x128xi1>
    %14 = vector.broadcast %cst_4 : f32 to vector<8x128xf32>
    %15 = arith.select %13, %11, %14 : vector<8x128xi1>, vector<8x128xf32>
    %c1_i32 = arith.constant 1 : i32
    %16 = tpu.dynamic_rotate %15 by %c1_i32 dim 1 : vector<8x128xf32>, i32 -> vector<8x128xf32>
    %17 = arith.addf %15, %16 : vector<8x128xf32>
    %c2_i32 = arith.constant 2 : i32
    %18 = tpu.dynamic_rotate %17 by %c2_i32 dim 1 : vector<8x128xf32>, i32 -> vector<8x128xf32>
    %19 = arith.addf %17, %18 : vector<8x128xf32>
    %c4_i32 = arith.constant 4 : i32
    %20 = tpu.dynamic_rotate %19 by %c4_i32 dim 1 : vector<8x128xf32>, i32 -> vector<8x128xf32>
    %21 = arith.addf %19, %20 : vector<8x128xf32>
    %c8_i32 = arith.constant 8 : i32
    %22 = tpu.dynamic_rotate %21 by %c8_i32 dim 1 : vector<8x128xf32>, i32 -> vector<8x128xf32>
    %23 = arith.addf %21, %22 : vector<8x128xf32>
    %24 = arith.subf %23, %15 : vector<8x128xf32>
    %25 = vector.shape_cast %23 : vector<8x128xf32> to vector<8x1x128xf32>
    %26 = vector.extract_strided_slice %24 {offsets = [0, 0], sizes = [8, 16], strides = [1, 1]} : vector<8x128xf32> to vector<8x16xf32>
    %27 = vector.shape_cast %26 : vector<8x16xf32> to vector<8x16x1xf32>
    %28 = vector.broadcast %25 : vector<8x1x128xf32> to vector<8x16x128xf32>
    %29 = vector.broadcast %27 : vector<8x16x1xf32> to vector<8x16x128xf32>
    %30 = arith.subf %28, %29 : vector<8x16x128xf32>
    %31 = vector.shape_cast %2 : vector<16x128xi1> to vector<1x16x128xi1>
    %32 = vector.shape_cast %0 : vector<16x128xf32> to vector<1x16x128xf32>
    %33 = vector.broadcast %32 : vector<1x16x128xf32> to vector<8x16x128xf32>
    %34 = arith.mulf %30, %33 : vector<8x16x128xf32>
    %cst_5 = arith.constant -1.000000e+30 : f32
    %35 = vector.shape_cast %31 : vector<1x16x128xi1> to vector<1x16x128xi1>
    %36 = vector.broadcast %35 : vector<1x16x128xi1> to vector<8x16x128xi1>
    %37 = vector.broadcast %cst_5 : f32 to vector<8x16x128xf32>
    %38 = arith.select %36, %34, %37 : vector<8x16x128xi1>, vector<8x16x128xf32>
    %c127_i32 = arith.constant 127 : i32
    %39 = tpu.dynamic_rotate %38 by %c127_i32 dim 2 : vector<8x16x128xf32>, i32 -> vector<8x16x128xf32>
    %40 = arith.maximumf %38, %39 : vector<8x16x128xf32>
    %c126_i32 = arith.constant 126 : i32
    %41 = tpu.dynamic_rotate %40 by %c126_i32 dim 2 : vector<8x16x128xf32>, i32 -> vector<8x16x128xf32>
    %42 = arith.maximumf %40, %41 : vector<8x16x128xf32>
    %c124_i32 = arith.constant 124 : i32
    %43 = tpu.dynamic_rotate %42 by %c124_i32 dim 2 : vector<8x16x128xf32>, i32 -> vector<8x16x128xf32>
    %44 = arith.maximumf %42, %43 : vector<8x16x128xf32>
    %c120_i32 = arith.constant 120 : i32
    %45 = tpu.dynamic_rotate %44 by %c120_i32 dim 2 : vector<8x16x128xf32>, i32 -> vector<8x16x128xf32>
    %46 = arith.maximumf %44, %45 : vector<8x16x128xf32>
    %47 = vector.shape_cast %2 : vector<16x128xi1> to vector<1x16x128xi1>
    %cst_6 = arith.constant 1.000000e+30 : f32
    %48 = vector.shape_cast %47 : vector<1x16x128xi1> to vector<1x16x128xi1>
    %49 = vector.broadcast %48 : vector<1x16x128xi1> to vector<8x16x128xi1>
    %50 = vector.broadcast %cst_6 : f32 to vector<8x16x128xf32>
    %51 = arith.select %49, %46, %50 : vector<8x16x128xi1>, vector<8x16x128xf32>
    %cst_7 = arith.constant dense<0x7F800000> : vector<8x128xf32>
    %52 = vector.multi_reduction <minimumf>, %51, %cst_7 [1] : vector<8x16x128xf32> to vector<8x128xf32>
    %53 = arith.subf %7, %52 : vector<8x128xf32>
    %c0_8 = arith.constant 0 : index
    %c0_9 = arith.constant 0 : index
    %54 = vector.load %arg2[%c0_8, %c0_9] : memref<1x256xi32, #tpu.memory_space<vmem>>, vector<1x256xi32>
    %55 = vector.shape_cast %54 : vector<1x256xi32> to vector<1x1x256xi32>
    %c0_10 = arith.constant 0 : index
    %c0_11 = arith.constant 0 : index
    %56 = vector.load %arg5[%c0_10, %c0_11] : memref<8x16xi32, #tpu.memory_space<vmem>>, vector<8x16xi32>
    %57 = vector.shape_cast %56 : vector<8x16xi32> to vector<8x16x1xi32>
    %58 = vector.broadcast %57 : vector<8x16x1xi32> to vector<8x16x256xi32>
    %59 = vector.broadcast %55 : vector<1x1x256xi32> to vector<8x16x256xi32>
    %60 = arith.cmpi eq, %58, %59 : vector<8x16x256xi32>
    %61 = vector.extract_strided_slice %53 {offsets = [0, 0], sizes = [8, 16], strides = [1, 1]} : vector<8x128xf32> to vector<8x16xf32>
    %62 = vector.shape_cast %61 : vector<8x16xf32> to vector<8x16x1xf32>
    %cst_12 = arith.constant 0.000000e+00 : f32
    %63 = vector.shape_cast %62 : vector<8x16x1xf32> to vector<8x16x1xf32>
    %64 = vector.broadcast %63 : vector<8x16x1xf32> to vector<8x16x256xf32>
    %65 = vector.broadcast %cst_12 : f32 to vector<8x16x256xf32>
    %66 = arith.select %60, %64, %65 : vector<8x16x256xi1>, vector<8x16x256xf32>
    %cst_13 = arith.constant dense<0.000000e+00> : vector<8x256xf32>
    %67 = vector.multi_reduction <add>, %66, %cst_13 [1] : vector<8x16x256xf32> to vector<8x256xf32>
    %c0_14 = arith.constant 0 : index
    %c0_15 = arith.constant 0 : index
    %68 = vector.load %arg3[%c0_14, %c0_15] : memref<1x256xf32, #tpu.memory_space<vmem>>, vector<1x256xf32>
    %69 = vector.broadcast %68 : vector<1x256xf32> to vector<8x256xf32>
    %70 = arith.subf %67, %69 : vector<8x256xf32>
    %71 = math.absf %70 : vector<8x256xf32>
    %cst_16 = arith.constant 1.000000e+00 : f32
    %72 = vector.broadcast %cst_16 : f32 to vector<8x256xf32>
    %73 = arith.subf %72, %71 : vector<8x256xf32>
    %cst_17 = arith.constant 0.000000e+00 : f32
    %74 = vector.broadcast %cst_17 : f32 to vector<8x256xf32>
    %75 = arith.maximumf %73, %74 : vector<8x256xf32>
    %c0_18 = arith.constant 0 : index
    %c0_19 = arith.constant 0 : index
    %76 = vector.load %arg6[%c0_18, %c0_19] : memref<8x256xf32, #tpu.memory_space<vmem>>, vector<8x256xf32>
    tpu.vector_store %arg6[%c0_18, %c0_19], %75 {strides = array<i32>} : memref<8x256xf32, #tpu.memory_space<vmem>>, vector<8x256xf32>,
    return
  }
  func.func @transform_0(%arg0: i32) -> (i32, i32) {
    %c0_i32 = arith.constant 0 : i32
    %c0_i32_0 = arith.constant 0 : i32
    %c0_i32_1 = arith.constant 0 : i32
    return %c0_i32, %c0_i32_0 : i32, i32
  }
  func.func @transform_1(%arg0: i32) -> (i32, i32) {
    %c0_i32 = arith.constant 0 : i32
    %c0_i32_0 = arith.constant 0 : i32
    %c0_i32_1 = arith.constant 0 : i32
    return %c0_i32, %c0_i32_0 : i32, i32
  }
  func.func @transform_2(%arg0: i32) -> (i32, i32) {
    %c0_i32 = arith.constant 0 : i32
    %c0_i32_0 = arith.constant 0 : i32
    %c0_i32_1 = arith.constant 0 : i32
    return %c0_i32, %c0_i32_0 : i32, i32
  }
  func.func @transform_3(%arg0: i32) -> (i32, i32) {
    %c0_i32 = arith.constant 0 : i32
    %c0_i32_0 = arith.constant 0 : i32
    return %arg0, %c0_i32 : i32, i32
  }
  func.func @transform_4(%arg0: i32) -> (i32, i32) {
    %c0_i32 = arith.constant 0 : i32
    %c0_i32_0 = arith.constant 0 : i32
    return %arg0, %c0_i32 : i32, i32
  }
  func.func @transform_5(%arg0: i32) -> (i32, i32) {
    %c0_i32 = arith.constant 0 : i32
    %c0_i32_0 = arith.constant 0 : i32
    return %arg0, %c0_i32 : i32, i32
  }
}

</mosaic_0001>

<bundles_post_ra>
// kernel: tpu_custom_call.1
= control target key start
LH: loop header
LB: loop body
LE: loop exit
PB: predicated region body
PF: predicated region fallthrough
CT: control target
= control target key end

     0   :  { %s2487_s0 = inlined_call_operand.hbm [shape: f32[16,128], index: 0, kind: input, shape index: {}]   ;;  %s2488_s1 = inlined_call_operand.vmem [shape: s32[1,256], index: 1, kind: input, shape index: {}]   ;;  %s2489_s2 = inlined_call_operand.vmem [shape: f32[1,256], index: 2, kind: input, shape index: {}]   ;;  %s2490_s3 = inlined_call_operand.hbm [shape: f32[16,128], index: 3, kind: input, shape index: {}]   ;;  %s2491_s4 = inlined_call_operand.hbm [shape: s32[16,16], index: 4, kind: input, shape index: {}]   ;;  %s2492_s5 = inlined_call_operand.hbm [shape: f32[16,256], index: 5, kind: output, shape index: {}]  }
   0x1   :  { %2499 = sst [smem:[#allocation12_spill]] %s2490_s3 }
   0x2   :  { %10 = vsyncpa [#allocation3], 0 }
   0x3   :  { %11 = vsyncpa [#allocation6], 0 }
   0x4   :  { %13 = vsyncpa [#allocation6 + $0x1], 0 }
   0x5   :  { %14 = vsyncpa [#allocation4], 0 }
   0x6   :  { %16 = vsyncpa [#allocation4 + $0x1], 0  ;;  %s1734_s18 = smov 0   ;;  %s1736_s19 = smov 0  }
   0x7   :  { %s1738_s20 = smov 0   ;;  %s1740_s21 = smov 0  }
   0x8 LB: > { %s1755_s22 = sadd.s32 1, %s1687_s21   ;;  %s92_s23 = sadd.s32 1, %s1683_s20  ;;  %s1687_s21 = sphi %s1740_s21, %s2520_s21   ;;  %s1683_s20 = sphi %s1738_s20, %s2519_s20   ;;  %s1679_s19 = sphi %s1736_s19, %s2518_s19   ;;  %s1675_s18 = sphi %s1734_s18, %s2517_s18  }
   0x9   : > { %s89_s24 = ssub.s32 %s1687_s21, %s1755_s22  ;;  %p99_p0 = scmp.ne.s32.totalorder %s1683_s20, %s1679_s19 }
   0xa   : > { %p90_p1 = scmp.eq.s32.totalorder %s89_s24, 0  ;;  %p100_p2 = scmp.eq.s32.totalorder %s1687_s21, 0 }
   0xb   : > { %p1482_p4 = scmp.lt.s32.totalorder %s1687_s21, 2  ;;  %s200_s26 = sand.u32 1, %s1687_s21  }
   0xc   : > { %s1766_s25 = scalar_select %p90_p1, %s1683_s20, %s92_s23  }
   0xd   : > { %p101_p5 = por %p100_p2, %p99_p0  ;;  %s202_s27 = sand.u32 1, %s1683_s20  }
   0xe   : > { %s1773_s28 = sshll.u32 %s202_s27, 3  ;;  %s1442_s29 = sshll.u32 %s1687_s21, 7 }
   0xf   : > { %s2500_s3 = sld [smem:[#allocation12_spill]]  ;;  %s204_s8 = scalar_lea.vmem [#allocation5], %s1773_s28 }
  0x10   : > { %s211_s9 = sshll.u32 %s204_s8, 4  ;;  %p1784_p6 = pnand %p1482_p4, %p101_p5  ;;  %s1788_s9 = int_to_ptr.vmem [resolvable:$true] %s211_s9 }
  0x11   : > { %s1790_s11 = scalar_lea.sflag [#allocation6], %s200_s26 }
  0x12   : > { %p1531_p8 = pneg %p1784_p6 }
  0x15   : > { %s1781_s7 = scalar_lea.hbm %s2500_s3, %s1442_s29  ;;  %s1534_s15 = scalar_lea.hbm %s2500_s3, 256 }
  0x16   : > { %s1529_s12 = scalar_lea.hbm %s1781_s7, 128  ;;  %p1535_p11 = scmp.lt.u32.totalorder %s1781_s7, %s2500_s3 }
  0x17   : > { %p1530_p7 = scmp.ne.s32.totalorder %s1781_s7, %s1529_s12  ;;  %p1536_p12 = scmp.lt.u32.totalorder %s1534_s15, %s1529_s12 }
  0x18   : > { %p1538_p1 = scmp.lt.u32.totalorder %s1529_s12, %s1781_s7 }
  0x19   : > { %p1532_p9 = pnand %p1531_p8, %p1530_p7  ;;  %p1537_p13 = por %p1536_p12, %p1535_p11 }
  0x1b   : > { %p1533_p10 = pneg %p1532_p9  ;;  %p1539_p2 = por %p1538_p1, %p1537_p13 }
  0x1d   : > { %p1540_p4 = pnand %p1539_p2, %p1533_p10 }
  0x1f   : > { %1543 = shalt.err (!%p1540_p4)
}
  0x20   : > { %s1544_s23 = scalar_lea.vmem %s1788_s9, 128  ;;  %s1689_s24 = smov [#allocation5]  }
  0x21   : > { %p1545_p5 = scmp.ne.s32.totalorder %s1788_s9, %s1544_s23  ;;  %s1549_s26 = sshll.u32 %s1689_s24, 4  ;;  %s1550_s26 = int_to_ptr.vmem [resolvable:$false] %s1549_s26 }
  0x22   : > { %s1551_s27 = scalar_lea.vmem %s1550_s26, 256  ;;  %p1552_p3 = scmp.lt.s32.totalorder %s1788_s9, %s1550_s26 }
  0x23   : > { %p1547_p7 = pnand %p1545_p5, %p1531_p8  ;;  %p1553_p11 = scmp.lt.s32.totalorder %s1551_s27, %s1544_s23 }
  0x25   : > { %p1548_p9 = pneg %p1547_p7  ;;  %p1554_p12 = por %p1553_p11, %p1552_p3 }
  0x27   : > { %p1555_p13 = pnand %p1554_p12, %p1548_p9 }
  0x29   : > { %1558 = shalt.err (!%p1555_p13)
}
  0x2a   : > { %1473 = dma.hbm_to_vmem [thread:$0]  (!%p1784_p6), %s1781_s7, 128, %s1788_s9, %s1790_s11  }
  0x2b   : > { %s1819_s30 = sadd.s32 4294967295, %s1687_s21   ;;  %s1437_s6 = sadd.s32 4294967294, %s1687_s21  }
  0x2c   : > { %p105_p3 = scmp.ne.s32.totalorder %s1679_s19, %s1675_s18  ;;  %p2493_p10 = scmp.eq.s32.totalorder %s1819_s30, 0 }
  0x2d   : > { %p155_p1 = scmp.eq.s32.totalorder %s1819_s30, 1  ;;  %p161_p2 = scmp.eq.s32.totalorder %s1437_s6, 1 }
  0x2e   : > { %p1828_p4 = por %p2493_p10, %p105_p3  ;;  %p1438_p5 = scmp.ge.s32.totalorder %s1687_s21, 1 }
  0x2f   : > { %p1836_p7 = por %p155_p1, %p99_p0  ;;  %p1840_p9 = por %p161_p2, %p105_p3 }
  0x30   : > { %s2502_s8 = scalar_select %p1828_p4, 1, 0 }
  0x31   : > { %s2503_s7 = scalar_select %p1836_p7, 1, 0 }
  0x32   : > { %s2504_s9 = scalar_select %p1840_p9, 1, 0 }
  0x33   : > { %p168_p11 = scmp.lt.s32.totalorder %s1687_s21, 3  ;;  %s1690_s13 = smov [#allocation2]  }
  0x34   : > { %s180_s14 = sshll.u32 %s1690_s13, 4  ;;  %s1854_s17 = scalar_lea.hbm %s2491_s4, %s1442_s29  ;;  %s1859_s14 = int_to_ptr.vmem [resolvable:$true] %s180_s14 }
  0x35   : > { %p1845_p12 = pnand %p1438_p5, %p168_p11  ;;  %s222_s23 = scalar_lea.vmem [#allocation7], %s1773_s28 }
  0x36   : > { %s229_s24 = sshll.u32 %s222_s23, 4  ;;  %s1559_s27 = scalar_lea.hbm %s1854_s17, 128  ;;  %s230_s24 = int_to_ptr.vmem [resolvable:$true] %s229_s24 }
  0x37   : > { %s2505_s12 = scalar_select %p1845_p12, 1, 0 }
  0x38   : > { %p1466_p0 = pneg %p1845_p12  ;;  %p1560_p3 = scmp.ne.s32.totalorder %s1854_s17, %s1559_s27 }
  0x39   : > { %s1564_s13 = scalar_lea.hbm %s2491_s4, 256  ;;  %p1565_p5 = scmp.lt.u32.totalorder %s1854_s17, %s2491_s4 }
  0x3a   : > { %p1863_p13 = pnand %p1466_p0, %p2493_p10  ;;  %p1562_p1 = pnand %p1560_p3, %p1531_p8 }
  0x3b   : > { %p1566_p11 = scmp.lt.u32.totalorder %s1564_s13, %s1559_s27  ;;  %p1568_p0 = scmp.lt.u32.totalorder %s1559_s27, %s1854_s17 }
  0x3c   : > { %s2506_s26 = scalar_select %p1863_p13, 1, 0 }
  0x3d   : > { %p1563_p2 = pneg %p1562_p1  ;;  %p1567_p9 = por %p1566_p11, %p1565_p5 }
  0x3f   : > { %p1569_p10 = por %p1568_p0, %p1567_p9 }
  0x41   : > { %p1570_p7 = pnand %p1569_p10, %p1563_p2 }
  0x43   : > { %1573 = shalt.err (!%p1570_p7)
}
  0x44   : > { %s1574_s16 = scalar_lea.vmem %s230_s24, 128  ;;  %s1691_s23 = smov [#allocation7]  }
  0x45   : > { %p1575_p4 = scmp.ne.s32.totalorder %s230_s24, %s1574_s16  ;;  %s1579_s29 = sshll.u32 %s1691_s23, 4  ;;  %s1580_s29 = int_to_ptr.vmem [resolvable:$false] %s1579_s29 }
  0x46   : > { %s1581_s6 = scalar_lea.vmem %s1580_s29, 256  ;;  %p1582_p12 = scmp.lt.s32.totalorder %s230_s24, %s1580_s29 }
  0x47   : > { %p1577_p3 = pnand %p1575_p4, %p1531_p8  ;;  %p1583_p13 = scmp.lt.s32.totalorder %s1581_s6, %s1574_s16 }
  0x49   : > { %p1578_p1 = pneg %p1577_p3  ;;  %p1584_p5 = por %p1583_p13, %p1582_p12 }
  0x4b   : > { %p1585_p11 = pnand %p1584_p5, %p1578_p1 }
  0x4d   : > { %1588 = shalt.err (!%p1585_p11)
}
  0x4e   : > { %1476 = dma.hbm_to_vmem [thread:$0]  (!%p1784_p6), %s1854_s17, 128, %s230_s24, %s1790_s11  }
  0x4f   : > { %s1589_s28 = scalar_lea.hbm %s2487_s0, 256  ;;  %p2507_p10 = scmp.ne.s32.totalorder %s2506_s26, 0 }
  0x50   : > { %p1590_p8 = scmp.ne.s32.totalorder %s2487_s0, %s1589_s28  ;;  %p1596_p12 = scmp.lt.u32.totalorder %s1589_s28, %s2487_s0 }
  0x51   : > { %p1591_p4 = pneg %p2507_p10 }
  0x53   : > { %p1592_p7 = pnand %p1591_p4, %p1590_p8 }
  0x55   : > { %p1593_p9 = pneg %p1592_p7 }
  0x57   : > { %p1598_p13 = pnand %p1596_p12, %p1593_p9 }
  0x59   : > { %1601 = shalt.err (!%p1598_p13)
}
  0x5a   : > { %s1602_s10 = scalar_lea.vmem %s1859_s14, 256  ;;  %p1610_p3 = scmp.lt.s32.totalorder %s1859_s14, %s1859_s14 }
  0x5b   : > { %p1603_p6 = scmp.ne.s32.totalorder %s1859_s14, %s1602_s10  ;;  %p1611_p1 = scmp.lt.s32.totalorder %s1602_s10, %s1602_s10 }
  0x5d   : > { %p1605_p2 = pnand %p1603_p6, %p1591_p4  ;;  %p1612_p5 = por %p1611_p1, %p1610_p3 }
  0x5f   : > { %p1606_p0 = pneg %p1605_p2 }
  0x61   : > { %p1613_p11 = pnand %p1612_p5, %p1606_p0 }
  0x63   : > { %1616 = shalt.err (!%p1613_p11)
}
  0x64   : > { %s1692_s3 = smov 128   ;;  %s1693_s11 = smov 8  }
  0x65   : > { %1469 = dma.hbm_to_vmem [thread:$0]  (!%p2507_p10), %s2487_s0, 256, %s1859_s14, [#allocation3], %s1692_s3, %s1692_s3, %s1693_s11  }
  0x66   : > { %p2508_p8 = scmp.ne.s32.totalorder %s2505_s12, 0 }
  0x67   : > { %p2509_p4 = scmp.eq.s32.totalorder (!%p2508_p8), %s1819_s30, 0 }
  0x68   : > { %238 = sbr.rel (%p2508_p8) target bundleno = 1432 (0x598), region = 40 }
  0x6f   : > { %1662 = dma.done.wait (%p2509_p4), [#allocation3], 256   ;;  %p2510_p7 = pmov %p2509_p4 }
  0x70   : > { %s244_s29 = sand.u32 1, %s1819_s30   ;;  %s1916_s6 = sand.u32 1, %s1679_s19  }
  0x71   : > { %1664 = vsyncadd (%p2510_p7), [#allocation3], 4294967040  ;;  %s1447_s26 = sshll.u32 %s1916_s6, 3  ;;  %s245_s27 = scalar_lea.sflag [#allocation6], %s244_s29 }
  0x72   : > { %s248_s14 = scalar_lea.vmem [#allocation5], %s1447_s26  ;;  %p2511_p10 = scmp.ne.s32.totalorder %s2502_s8, 0 }
  0x74   : > { %1666 = dma.done.wait (%p2511_p10), %s245_s27, 256  }
  0x75   : > { %1668 = vsyncadd (%p2511_p10), %s245_s27, 4294967040  ;;  %v293_v0 = vlaneseq  ;;  %v1925_v4 = vld [vmem:[%s248_s14] sm:$0xff]  ;;  %s1694_s12 = smov 1   ;;  %s1695_s13 = smov 2   ;;  %v1698_v33 = vmov 1966171168  }
  0x76   : > { %s1696_s8 = smov 4   ;;  %s1697_s28 = smov 8   ;;  %v319_v34 = vunpack.c.l.s4 %v1698_v33  ;;  %v1957_v42 = vld [vmem:[#allocation2 + $0x8] sm:$0xff]  ;;  %v1959_v43 = vld [vmem:[#allocation2] sm:$0xff]  ;;  %vm818_vm3 = vcmask 1041409   ;;  %vm820_vm4 = vcmask 1042434  }
  0x77   : > { %v294_v1 = vand.u32 127, %v293_v0  ;;  %v322_v13 = vshrl.u32 %v293_v0, 7  ;;  %vm292_vm1 = vcmp.gt.f32.partialorder %v1957_v42, 0.0  ;;  %vm291_vm2 = vcmp.gt.f32.partialorder %v1959_v43, 0.0  ;;  %s1699_s15 = smov 127   ;;  %s1700_s16 = smov 126  }
  0x78   : > { %v320_v35 = vunpack.c.0.s8 %v319_v34  ;;  %s1701_s23 = smov 124   ;;  %s1702_s10 = smov 120   ;;  %vm822_vm5 = vcmask 1043459   ;;  %vm824_vm6 = vcmask 1044484   ;;  %vm826_vm7 = vcmask 1045509  }
  0x79   : > { %v295_v2 = vsub.s32 16, %v294_v1  ;;  %vm298_vm0 = vcmp.lt.s32.totalorder %v294_v1, 16  ;;  %v1928_v15 = vsub.s32 0, %v322_v13  ;;  %v1934_v19 = vsub.s32 1, %v322_v13  ;;  %s257_s3 = scalar_lea.vmem [#allocation7], %s1447_s26  ;;  %s1449_s26 = sshll.u32 %s1916_s6, 4 }
  0x7a   : > { %v1937_v21 = vsub.s32 2, %v322_v13  ;;  %v1940_v23 = vsub.s32 3, %v322_v13  ;;  %v1943_v25 = vsub.s32 4, %v322_v13  ;;  %v1946_v27 = vsub.s32 5, %v322_v13  ;;  %s1455_s27 = sshll.u32 %s1819_s30, 8  ;;  %s288_s14 = scalar_lea.vmem [#allocation8], %s1449_s26 }
  0x7b   : > { %v296_v3 = vcvt.s32.f32 %v295_v2  ;;  %v1949_v29 = vsub.s32 6, %v322_v13  ;;  %v1952_v31 = vsub.s32 7, %v322_v13  ;;  %v323_v36 = vsub.s32 %v320_v35, %v322_v13  ;;  %p2514_p12 = scmp.ne.s32.totalorder %s2503_s7, 0 }
  0x7c   : > { %vm828_vm8 = vcmask 1046534   ;;  %vm2498_vm9 = vcmask 1047559  }
  0x7d   : > { %v299_v5 = vsub.f32 %v1925_v4, %v296_v3 }
  0x7f   : > { %v302_v6 = vsel %vm298_vm0, %v299_v5, 0.0 }
  0x80   : > { %303 = vrot.lane.b32.xlu0 %v302_v6, %s1694_s12  ;;  %s1335_s12 = sshll.u32 %s288_s14, 4  ;;  %s2443_s12 = int_to_ptr.vmem [resolvable:$true] %s1335_s12 }
  0xf2   : > { %v304_v7 = vpop.permute.xlu0 %303 }
  0xf3   : > { %v305_v8 = vadd.f32 %v304_v7, %v302_v6 }
  0xf5   : > { %306 = vrot.lane.b32.xlu0 %v305_v8, %s1695_s13 }
 0x167   : > { %v307_v9 = vpop.permute.xlu0 %306 }
 0x168   : > { %v308_v10 = vadd.f32 %v307_v9, %v305_v8 }
 0x16a   : > { %309 = vrot.lane.b32.xlu1 %v308_v10, %s1696_s8  ;;  %s2441_s8 = scalar_lea.hbm %s2492_s5, %s1455_s27 }
 0x1dc   : > { %v310_v11 = vpop.permute.xlu1 %309 }
 0x1dd   : > { %v311_v12 = vadd.f32 %v310_v11, %v308_v10 }
 0x1df   : > { %312 = vrot.lane.b32.xlu1 %v311_v12, %s1697_s28  ;;  %s1321_s28 = scalar_lea.sflag [#allocation4], %s1916_s6 }
 0x251   : > { %v313_v14 = vpop.permute.xlu1 %312 }
 0x252   : > { %v1930_v16 = vadd.f32 %v313_v14, %v311_v12 }
 0x254   : > { %v315_v17 = vsub.f32 %v1930_v16, %v302_v6  ;;  %v324_v37 = vrot.slane %v1930_v16, %v323_v36  ;;  %v317_v48 = vcombine.high %v1930_v16, %v1930_v16 }
 0x256   : > { %v369_v18 = vrot.slane %v315_v17, %v1928_v15  ;;  %v380_v20 = vrot.slane %v315_v17, %v1934_v19  ;;  %v391_v22 = vrot.slane %v315_v17, %v1937_v21  ;;  %v402_v24 = vrot.slane %v315_v17, %v1940_v23 }
 0x257   : > { %v413_v26 = vrot.slane %v315_v17, %v1943_v25  ;;  %v424_v28 = vrot.slane %v315_v17, %v1946_v27  ;;  %v435_v30 = vrot.slane %v315_v17, %v1949_v29  ;;  %v446_v32 = vrot.slane %v315_v17, %v1952_v31 }
 0x258   : > { %375 = vbcast.lane.b32.xlu1 %v369_v18, 264  ;;  %371 = vbcast.lane.b32.xlu0 %v369_v18, 256  ;;  %v340_v38 = vrot.slane %v324_v37, %v323_v36  ;;  %v332_v39 = vcombine.high %v324_v37, %v324_v37  ;;  %v331_v59 = vrot.slane %v317_v48, %v323_v36 }
 0x25a   : > { %v457_v40 = vrot.slane %v340_v38, %v1928_v15  ;;  %v354_v41 = vrot.slane %v332_v39, %v323_v36  ;;  %v362_v52 = vcombine.high %v340_v38, %v340_v38  ;;  %v347_v7 = vrot.slane %v331_v59, %v323_v36 }
 0x25b   : > { %v333_v11 = vcombine.high %v331_v59, %v331_v59 }
 0x25c   : > { %386 = vbcast.lane.b32.xlu1 %v380_v20, 264  ;;  %382 = vbcast.lane.b32.xlu0 %v380_v20, 256  ;;  %v461_v49 = vrot.slane %v354_v41, %v1928_v15  ;;  %v465_v60 = vrot.slane %v362_v52, %v1928_v15  ;;  %v364_v63 = vcombine.high %v354_v41, %v354_v41 }
 0x25d   : > { %v473_v20 = vrot.slane %v347_v7, %v1928_v15  ;;  %v363_v39 = vcombine.high %v347_v7, %v347_v7 }
 0x25e   : > { %v469_v8 = vrot.slane %v364_v63, %v1928_v15 }
 0x25f   : > { %v481_v48 = vrot.slane %v363_v39, %v1928_v15 }
 0x260   : > { %397 = vbcast.lane.b32.xlu1 %v391_v22, 264  ;;  %393 = vbcast.lane.b32.xlu0 %v391_v22, 256 }
 0x264   : > { %408 = vbcast.lane.b32.xlu1 %v402_v24, 264  ;;  %404 = vbcast.lane.b32.xlu0 %v402_v24, 256 }
 0x268   : > { %419 = vbcast.lane.b32.xlu1 %v413_v26, 264  ;;  %415 = vbcast.lane.b32.xlu0 %v413_v26, 256  ;;  %v361_v26 = vrot.slane %v333_v11, %v323_v36 }
 0x26a   : > { %v477_v36 = vrot.slane %v361_v26, %v1928_v15 }
 0x26c   : > { %430 = vbcast.lane.b32.xlu1 %v424_v28, 264  ;;  %426 = vbcast.lane.b32.xlu0 %v424_v28, 256 }
 0x270   : > { %441 = vbcast.lane.b32.xlu1 %v435_v30, 264  ;;  %437 = vbcast.lane.b32.xlu0 %v435_v30, 256 }
 0x274   : > { %452 = vbcast.lane.b32.xlu1 %v446_v32, 264  ;;  %448 = vbcast.lane.b32.xlu0 %v446_v32, 256 }
 0x2ca   : > { %v376_v44 = vpop.permute.xlu1 %375  ;;  %v372_v45 = vpop.permute.xlu0 %371 }
 0x2cb   : > { %v495_v46 = vsub.f32 %v457_v40, %v376_v44  ;;  %v494_v47 = vsub.f32 %v457_v40, %v372_v45 }
 0x2cd   : > { %v511_v50 = vmul.f32 %v495_v46, %v1957_v42  ;;  %v510_v51 = vmul.f32 %v494_v47, %v1959_v43 }
 0x2ce   : > { %v387_v53 = vpop.permute.xlu1 %386  ;;  %v383_v54 = vpop.permute.xlu0 %382 }
 0x2cf   : > { %v497_v55 = vsub.f32 %v461_v49, %v387_v53  ;;  %v496_v56 = vsub.f32 %v461_v49, %v383_v54  ;;  %v1970_v57 = vsel %vm292_vm1, %v511_v50, -1e+30  ;;  %v1974_v58 = vsel %vm291_vm2, %v510_v51, -1e+30 }
 0x2d0   : > { %548 = vrot.lane.b32.xlu1 %v1970_v57, %s1699_s15  ;;  %546 = vrot.lane.b32.xlu0 %v1974_v58, %s1699_s15  ;;  %v365_v51 = vcombine.high %v361_v26, %v361_v26 }
 0x2d1   : > { %v513_v61 = vmul.f32 %v497_v55, %v1957_v42  ;;  %v512_v62 = vmul.f32 %v496_v56, %v1959_v43 }
 0x2d2   : > { %v398_v0 = vpop.permute.xlu1 %397  ;;  %v394_v1 = vpop.permute.xlu0 %393 }
 0x2d3   : > { %v499_v2 = vsub.f32 %v465_v60, %v398_v0  ;;  %v498_v3 = vsub.f32 %v465_v60, %v394_v1  ;;  %v1985_v5 = vsel %vm292_vm1, %v513_v61, -1e+30  ;;  %v1989_v6 = vsel %vm291_vm2, %v512_v62, -1e+30 }
 0x2d4   : > { %552 = vrot.lane.b32.xlu1 %v1985_v5, %s1699_s15  ;;  %550 = vrot.lane.b32.xlu0 %v1989_v6, %s1699_s15  ;;  %v485_v60 = vrot.slane %v365_v51, %v1928_v15 }
 0x2d5   : > { %v515_v9 = vmul.f32 %v499_v2, %v1957_v42  ;;  %v514_v10 = vmul.f32 %v498_v3, %v1959_v43 }
 0x2d6   : > { %v409_v12 = vpop.permute.xlu1 %408  ;;  %v405_v13 = vpop.permute.xlu0 %404 }
 0x2d7   : > { %v501_v14 = vsub.f32 %v469_v8, %v409_v12  ;;  %v500_v16 = vsub.f32 %v469_v8, %v405_v13  ;;  %v2000_v17 = vsel %vm292_vm1, %v515_v9, -1e+30  ;;  %v2004_v18 = vsel %vm291_vm2, %v514_v10, -1e+30 }
 0x2d8   : > { %556 = vrot.lane.b32.xlu1 %v2000_v17, %s1699_s15  ;;  %554 = vrot.lane.b32.xlu0 %v2004_v18, %s1699_s15 }
 0x2d9   : > { %v517_v22 = vmul.f32 %v501_v14, %v1957_v42  ;;  %v516_v24 = vmul.f32 %v500_v16, %v1959_v43 }
 0x2da   : > { %v420_v28 = vpop.permute.xlu1 %419  ;;  %v416_v30 = vpop.permute.xlu0 %415 }
 0x2db   : > { %v503_v32 = vsub.f32 %v473_v20, %v420_v28  ;;  %v502_v33 = vsub.f32 %v473_v20, %v416_v30  ;;  %v2015_v34 = vsel %vm292_vm1, %v517_v22, -1e+30  ;;  %v2019_v35 = vsel %vm291_vm2, %v516_v24, -1e+30 }
 0x2dc   : > { %560 = vrot.lane.b32.xlu1 %v2015_v34, %s1699_s15  ;;  %558 = vrot.lane.b32.xlu0 %v2019_v35, %s1699_s15 }
 0x2dd   : > { %v519_v37 = vmul.f32 %v503_v32, %v1957_v42  ;;  %v518_v38 = vmul.f32 %v502_v33, %v1959_v43 }
 0x2de   : > { %v431_v40 = vpop.permute.xlu1 %430  ;;  %v427_v41 = vpop.permute.xlu0 %426 }
 0x2df   : > { %v505_v44 = vsub.f32 %v477_v36, %v431_v40  ;;  %v504_v45 = vsub.f32 %v477_v36, %v427_v41  ;;  %v539_v46 = vsel %vm292_vm1, %v519_v37, -1e+30  ;;  %v538_v47 = vsel %vm291_vm2, %v518_v38, -1e+30 }
 0x2e0   : > { %564 = vrot.lane.b32.xlu1 %v539_v46, %s1699_s15  ;;  %562 = vrot.lane.b32.xlu0 %v538_v47, %s1699_s15 }
 0x2e1   : > { %v521_v49 = vmul.f32 %v505_v44, %v1957_v42  ;;  %v520_v50 = vmul.f32 %v504_v45, %v1959_v43 }
 0x2e2   : > { %v442_v52 = vpop.permute.xlu1 %441  ;;  %v438_v53 = vpop.permute.xlu0 %437 }
 0x2e3   : > { %v507_v54 = vsub.f32 %v481_v48, %v442_v52  ;;  %v506_v55 = vsub.f32 %v481_v48, %v438_v53  ;;  %v541_v56 = vsel %vm292_vm1, %v521_v49, -1e+30  ;;  %v540_v59 = vsel %vm291_vm2, %v520_v50, -1e+30 }
 0x2e4   : > { %568 = vrot.lane.b32.xlu1 %v541_v56, %s1699_s15  ;;  %566 = vrot.lane.b32.xlu0 %v540_v59, %s1699_s15 }
 0x2e5   : > { %v523_v61 = vmul.f32 %v507_v54, %v1957_v42  ;;  %v522_v62 = vmul.f32 %v506_v55, %v1959_v43 }
 0x2e6   : > { %v453_v63 = vpop.permute.xlu1 %452  ;;  %v449_v0 = vpop.permute.xlu0 %448 }
 0x2e7   : > { %v509_v1 = vsub.f32 %v485_v60, %v453_v63  ;;  %v508_v2 = vsub.f32 %v485_v60, %v449_v0  ;;  %v543_v3 = vsel %vm292_vm1, %v523_v61, -1e+30  ;;  %v542_v7 = vsel %vm291_vm2, %v522_v62, -1e+30 }
 0x2e8   : > { %572 = vrot.lane.b32.xlu1 %v543_v3, %s1699_s15  ;;  %570 = vrot.lane.b32.xlu0 %v542_v7, %s1699_s15 }
 0x2e9   : > { %v525_v8 = vmul.f32 %v509_v1, %v1957_v42  ;;  %v524_v9 = vmul.f32 %v508_v2, %v1959_v43 }
 0x2eb   : > { %v545_v10 = vsel %vm292_vm1, %v525_v8, -1e+30  ;;  %v544_v11 = vsel %vm291_vm2, %v524_v9, -1e+30 }
 0x2ec   : > { %576 = vrot.lane.b32.xlu1 %v545_v10, %s1699_s15  ;;  %574 = vrot.lane.b32.xlu0 %v544_v11, %s1699_s15  ;;  %s1617_s15 = scalar_lea.vmem %s2443_s12, 256 }
 0x2ed   : > { %p1618_p9 = scmp.ne.s32.totalorder %s2443_s12, %s1617_s15 }
 0x2ef   : > { %p1619_p13 = pnand %p1618_p9, %p2514_p12 }
 0x2f1   : > { %p1620_p6 = pneg %p1619_p13 }
 0x342   : > { %v549_v12 = vpop.permute.xlu1 %548  ;;  %v547_v13 = vpop.permute.xlu0 %546 }
 0x343   : > { %v579_v14 = vmax.f32 %v1970_v57, %v549_v12  ;;  %v578_v16 = vmax.f32 %v1974_v58, %v547_v13 }
 0x345   : > { %596 = vrot.lane.b32.xlu1 %v579_v14, %s1700_s16  ;;  %594 = vrot.lane.b32.xlu0 %v578_v16, %s1700_s16 }
 0x346   : > { %v553_v20 = vpop.permute.xlu1 %552  ;;  %v551_v22 = vpop.permute.xlu0 %550 }
 0x347   : > { %v581_v24 = vmax.f32 %v1985_v5, %v553_v20  ;;  %v580_v26 = vmax.f32 %v1989_v6, %v551_v22 }
 0x349   : > { %600 = vrot.lane.b32.xlu1 %v581_v24, %s1700_s16  ;;  %598 = vrot.lane.b32.xlu0 %v580_v26, %s1700_s16 }
 0x34a   : > { %v557_v28 = vpop.permute.xlu1 %556  ;;  %v555_v30 = vpop.permute.xlu0 %554 }
 0x34b   : > { %v583_v57 = vmax.f32 %v2000_v17, %v557_v28  ;;  %v582_v58 = vmax.f32 %v2004_v18, %v555_v30 }
 0x34d   : > { %604 = vrot.lane.b32.xlu1 %v583_v57, %s1700_s16  ;;  %602 = vrot.lane.b32.xlu0 %v582_v58, %s1700_s16 }
 0x34e   : > { %v561_v32 = vpop.permute.xlu1 %560  ;;  %v559_v33 = vpop.permute.xlu0 %558 }
 0x34f   : > { %v585_v5 = vmax.f32 %v2015_v34, %v561_v32  ;;  %v584_v6 = vmax.f32 %v2019_v35, %v559_v33 }
 0x351   : > { %608 = vrot.lane.b32.xlu1 %v585_v5, %s1700_s16  ;;  %606 = vrot.lane.b32.xlu0 %v584_v6, %s1700_s16 }
 0x352   : > { %v565_v36 = vpop.permute.xlu1 %564  ;;  %v563_v37 = vpop.permute.xlu0 %562 }
 0x353   : > { %v587_v38 = vmax.f32 %v539_v46, %v565_v36  ;;  %v586_v17 = vmax.f32 %v538_v47, %v563_v37 }
 0x355   : > { %612 = vrot.lane.b32.xlu1 %v587_v38, %s1700_s16  ;;  %610 = vrot.lane.b32.xlu0 %v586_v17, %s1700_s16 }
 0x356   : > { %v569_v18 = vpop.permute.xlu1 %568  ;;  %v567_v39 = vpop.permute.xlu0 %566 }
 0x357   : > { %v589_v40 = vmax.f32 %v541_v56, %v569_v18  ;;  %v588_v41 = vmax.f32 %v540_v59, %v567_v39 }
 0x359   : > { %616 = vrot.lane.b32.xlu1 %v589_v40, %s1700_s16  ;;  %614 = vrot.lane.b32.xlu0 %v588_v41, %s1700_s16 }
 0x35a   : > { %v573_v34 = vpop.permute.xlu1 %572  ;;  %v571_v35 = vpop.permute.xlu0 %570 }
 0x35b   : > { %v591_v44 = vmax.f32 %v543_v3, %v573_v34  ;;  %v590_v45 = vmax.f32 %v542_v7, %v571_v35 }
 0x35d   : > { %620 = vrot.lane.b32.xlu1 %v591_v44, %s1700_s16  ;;  %618 = vrot.lane.b32.xlu0 %v590_v45, %s1700_s16 }
 0x35e   : > { %v577_v46 = vpop.permute.xlu1 %576  ;;  %v575_v47 = vpop.permute.xlu0 %574 }
 0x35f   : > { %v593_v48 = vmax.f32 %v545_v10, %v577_v46  ;;  %v592_v49 = vmax.f32 %v544_v11, %v575_v47 }
 0x361   : > { %624 = vrot.lane.b32.xlu1 %v593_v48, %s1700_s16  ;;  %622 = vrot.lane.b32.xlu0 %v592_v49, %s1700_s16  ;;  %s1703_s16 = smov [#allocation8]  }
 0x3b7   : > { %v597_v50 = vpop.permute.xlu1 %596  ;;  %v595_v51 = vpop.permute.xlu0 %594 }
 0x3b8   : > { %v627_v52 = vmax.f32 %v579_v14, %v597_v50  ;;  %v626_v53 = vmax.f32 %v578_v16, %v595_v51 }
 0x3ba   : > { %644 = vrot.lane.b32.xlu1 %v627_v52, %s1701_s23  ;;  %642 = vrot.lane.b32.xlu0 %v626_v53, %s1701_s23 }
 0x3bb   : > { %v601_v54 = vpop.permute.xlu1 %600  ;;  %v599_v55 = vpop.permute.xlu0 %598 }
 0x3bc   : > { %v629_v56 = vmax.f32 %v581_v24, %v601_v54  ;;  %v628_v59 = vmax.f32 %v580_v26, %v599_v55 }
 0x3be   : > { %648 = vrot.lane.b32.xlu1 %v629_v56, %s1701_s23  ;;  %646 = vrot.lane.b32.xlu0 %v628_v59, %s1701_s23 }
 0x3bf   : > { %v605_v60 = vpop.permute.xlu1 %604  ;;  %v603_v61 = vpop.permute.xlu0 %602 }
 0x3c0   : > { %v631_v62 = vmax.f32 %v583_v57, %v605_v60  ;;  %v630_v63 = vmax.f32 %v582_v58, %v603_v61  ;;  %v835_v61 = vld [vmem:[%s257_s3] sm:$0xff] }
 0x3c2   : > { %652 = vrot.lane.b32.xlu1 %v631_v62, %s1701_s23  ;;  %650 = vrot.lane.b32.xlu0 %v630_v63, %s1701_s23 }
 0x3c3   : > { %v609_v0 = vpop.permute.xlu1 %608  ;;  %v607_v1 = vpop.permute.xlu0 %606 }
 0x3c4   : > { %v633_v2 = vmax.f32 %v585_v5, %v609_v0  ;;  %v632_v3 = vmax.f32 %v584_v6, %v607_v1  ;;  %v850_v0 = vrot.slane %v835_v61, %v1934_v19  ;;  %v861_v1 = vrot.slane %v835_v61, %v1937_v21 }
 0x3c6   : > { %656 = vrot.lane.b32.xlu1 %v633_v2, %s1701_s23  ;;  %654 = vrot.lane.b32.xlu0 %v632_v3, %s1701_s23 }
 0x3c7   : > { %v613_v7 = vpop.permute.xlu1 %612  ;;  %v611_v8 = vpop.permute.xlu0 %610 }
 0x3c8   : > { %v635_v9 = vmax.f32 %v587_v38, %v613_v7  ;;  %v634_v10 = vmax.f32 %v586_v17, %v611_v8  ;;  %v883_v7 = vrot.slane %v835_v61, %v1943_v25  ;;  %v894_v8 = vrot.slane %v835_v61, %v1946_v27 }
 0x3ca   : > { %660 = vrot.lane.b32.xlu1 %v635_v9, %s1701_s23  ;;  %658 = vrot.lane.b32.xlu0 %v634_v10, %s1701_s23 }
 0x3cb   : > { %v617_v11 = vpop.permute.xlu1 %616  ;;  %v615_v12 = vpop.permute.xlu0 %614 }
 0x3cc   : > { %v637_v13 = vmax.f32 %v589_v40, %v617_v11  ;;  %v636_v14 = vmax.f32 %v588_v41, %v615_v12 }
 0x3ce   : > { %664 = vrot.lane.b32.xlu1 %v637_v13, %s1701_s23  ;;  %662 = vrot.lane.b32.xlu0 %v636_v14, %s1701_s23 }
 0x3cf   : > { %v621_v16 = vpop.permute.xlu1 %620  ;;  %v619_v20 = vpop.permute.xlu0 %618 }
 0x3d0   : > { %v639_v22 = vmax.f32 %v591_v44, %v621_v16  ;;  %v638_v24 = vmax.f32 %v590_v45, %v619_v20 }
 0x3d2   : > { %668 = vrot.lane.b32.xlu1 %v639_v22, %s1701_s23  ;;  %666 = vrot.lane.b32.xlu0 %v638_v24, %s1701_s23 }
 0x3d3   : > { %v625_v26 = vpop.permute.xlu1 %624  ;;  %v623_v28 = vpop.permute.xlu0 %622 }
 0x3d4   : > { %v641_v30 = vmax.f32 %v593_v48, %v625_v26  ;;  %v640_v57 = vmax.f32 %v592_v49, %v623_v28 }
 0x3d6   : > { %672 = vrot.lane.b32.xlu1 %v641_v30, %s1701_s23  ;;  %670 = vrot.lane.b32.xlu0 %v640_v57, %s1701_s23  ;;  %s1621_s23 = sshll.u32 %s1703_s16, 4  ;;  %s1622_s23 = int_to_ptr.vmem [resolvable:$false] %s1621_s23 }
 0x3d7   : > { %p1624_p2 = scmp.lt.s32.totalorder %s2443_s12, %s1622_s23 }
 0x42c   : > { %v645_v58 = vpop.permute.xlu1 %644  ;;  %v643_v32 = vpop.permute.xlu0 %642 }
 0x42d   : > { %v2100_v33 = vmax.f32 %v627_v52, %v645_v58  ;;  %v2102_v5 = vmax.f32 %v626_v53, %v643_v32 }
 0x42f   : > { %692 = vrot.lane.b32.xlu1 %v2100_v33, %s1702_s10  ;;  %690 = vrot.lane.b32.xlu0 %v2102_v5, %s1702_s10 }
 0x430   : > { %v649_v6 = vpop.permute.xlu1 %648  ;;  %v647_v36 = vpop.permute.xlu0 %646 }
 0x431   : > { %v2108_v37 = vmax.f32 %v629_v56, %v649_v6  ;;  %v2110_v38 = vmax.f32 %v628_v59, %v647_v36 }
 0x433   : > { %696 = vrot.lane.b32.xlu1 %v2108_v37, %s1702_s10  ;;  %694 = vrot.lane.b32.xlu0 %v2110_v38, %s1702_s10 }
 0x434   : > { %v653_v17 = vpop.permute.xlu1 %652  ;;  %v651_v18 = vpop.permute.xlu0 %650 }
 0x435   : > { %v2116_v39 = vmax.f32 %v631_v62, %v653_v17  ;;  %v2118_v40 = vmax.f32 %v630_v63, %v651_v18 }
 0x437   : > { %700 = vrot.lane.b32.xlu1 %v2116_v39, %s1702_s10  ;;  %698 = vrot.lane.b32.xlu0 %v2118_v40, %s1702_s10 }
 0x438   : > { %v657_v41 = vpop.permute.xlu1 %656  ;;  %v655_v34 = vpop.permute.xlu0 %654 }
 0x439   : > { %v2124_v35 = vmax.f32 %v633_v2, %v657_v41  ;;  %v2126_v44 = vmax.f32 %v632_v3, %v655_v34  ;;  %v839_v2 = vrot.slane %v835_v61, %v1928_v15  ;;  %v872_v3 = vrot.slane %v835_v61, %v1940_v23 }
 0x43b   : > { %704 = vrot.lane.b32.xlu1 %v2124_v35, %s1702_s10  ;;  %702 = vrot.lane.b32.xlu0 %v2126_v44, %s1702_s10 }
 0x43c   : > { %v661_v45 = vpop.permute.xlu1 %660  ;;  %v659_v46 = vpop.permute.xlu0 %658 }
 0x43d   : > { %v2132_v47 = vmax.f32 %v635_v9, %v661_v45  ;;  %v2134_v48 = vmax.f32 %v634_v10, %v659_v46  ;;  %v905_v9 = vrot.slane %v835_v61, %v1949_v29  ;;  %v916_v10 = vrot.slane %v835_v61, %v1952_v31 }
 0x43f   : > { %708 = vrot.lane.b32.xlu1 %v2132_v47, %s1702_s10  ;;  %706 = vrot.lane.b32.xlu0 %v2134_v48, %s1702_s10 }
 0x440   : > { %v665_v49 = vpop.permute.xlu1 %664  ;;  %v663_v50 = vpop.permute.xlu0 %662 }
 0x441   : > { %v2140_v51 = vmax.f32 %v637_v13, %v665_v49  ;;  %v2142_v52 = vmax.f32 %v636_v14, %v663_v50 }
 0x443   : > { %712 = vrot.lane.b32.xlu1 %v2140_v51, %s1702_s10  ;;  %710 = vrot.lane.b32.xlu0 %v2142_v52, %s1702_s10 }
 0x444   : > { %v669_v53 = vpop.permute.xlu1 %668  ;;  %v667_v54 = vpop.permute.xlu0 %666 }
 0x445   : > { %v2148_v55 = vmax.f32 %v639_v22, %v669_v53  ;;  %v2150_v56 = vmax.f32 %v638_v24, %v667_v54 }
 0x447   : > { %716 = vrot.lane.b32.xlu1 %v2148_v55, %s1702_s10  ;;  %714 = vrot.lane.b32.xlu0 %v2150_v56, %s1702_s10 }
 0x448   : > { %v673_v59 = vpop.permute.xlu1 %672  ;;  %v671_v60 = vpop.permute.xlu0 %670 }
 0x449   : > { %v2158_v62 = vmax.f32 %v641_v30, %v673_v59  ;;  %v2160_v63 = vmax.f32 %v640_v57, %v671_v60 }
 0x44b   : > { %720 = vrot.lane.b32.xlu1 %v2158_v62, %s1702_s10  ;;  %718 = vrot.lane.b32.xlu0 %v2160_v63, %s1702_s10  ;;  %s1623_s10 = scalar_lea.vmem %s1622_s23, 512 }
 0x44c   : > { %p1625_p0 = scmp.lt.s32.totalorder %s1623_s10, %s1617_s15 }
 0x44e   : > { %p1626_p3 = por %p1625_p0, %p1624_p2 }
 0x44f   : > { %856 = vbcast.lane.b32.xlu1 %v850_v0, 264  ;;  %852 = vbcast.lane.b32.xlu0 %v850_v0, 256 }
 0x450   : > { %p1627_p1 = pnand %p1626_p3, %p1620_p6 }
 0x453   : > { %867 = vbcast.lane.b32.xlu1 %v861_v1, 264  ;;  %863 = vbcast.lane.b32.xlu0 %v861_v1, 256 }
 0x457   : > { %845 = vbcast.lane.b32.xlu1 %v839_v2, 264  ;;  %841 = vbcast.lane.b32.xlu0 %v839_v2, 256 }
 0x45b   : > { %878 = vbcast.lane.b32.xlu1 %v872_v3, 264  ;;  %874 = vbcast.lane.b32.xlu0 %v872_v3, 256 }
 0x45f   : > { %889 = vbcast.lane.b32.xlu1 %v883_v7, 264  ;;  %885 = vbcast.lane.b32.xlu0 %v883_v7, 256 }
 0x463   : > { %900 = vbcast.lane.b32.xlu1 %v894_v8, 264  ;;  %896 = vbcast.lane.b32.xlu0 %v894_v8, 256 }
 0x467   : > { %911 = vbcast.lane.b32.xlu1 %v905_v9, 264  ;;  %907 = vbcast.lane.b32.xlu0 %v905_v9, 256 }
 0x46b   : > { %922 = vbcast.lane.b32.xlu1 %v916_v10, 264  ;;  %918 = vbcast.lane.b32.xlu0 %v916_v10, 256 }
 0x4a1   : > { %v693_v11 = vpop.permute.xlu1 %692  ;;  %v691_v12 = vpop.permute.xlu0 %690 }
 0x4a2   : > { %v723_v22 = vmax.f32 %v2100_v33, %v693_v11  ;;  %v722_v24 = vmax.f32 %v2102_v5, %v691_v12 }
 0x4a4   : > { %v739_v6 = vsel %vm292_vm1, %v723_v22, 1e+30  ;;  %v738_v33 = vsel %vm291_vm2, %v722_v24, 1e+30 }
 0x4a5   : > { %v697_v13 = vpop.permute.xlu1 %696  ;;  %v695_v14 = vpop.permute.xlu0 %694  ;;  %v754_v41 = vmin.f32 %v738_v33, %v739_v6 }
 0x4a6   : > { %v725_v16 = vmax.f32 %v2108_v37, %v697_v13  ;;  %v724_v20 = vmax.f32 %v2110_v38, %v695_v14 }
 0x4a7   : > { %v755_v61 = vrot.slane %v754_v41, 4 }
 0x4a8   : > { %v741_v30 = vsel %vm292_vm1, %v725_v16, 1e+30  ;;  %v740_v57 = vsel %vm291_vm2, %v724_v20, 1e+30 }
 0x4a9   : > { %v701_v26 = vpop.permute.xlu1 %700  ;;  %v699_v28 = vpop.permute.xlu0 %698  ;;  %v761_v37 = vmin.f32 %v740_v57, %v741_v30 }
 0x4aa   : > { %v727_v58 = vmax.f32 %v2116_v39, %v701_v26  ;;  %v726_v32 = vmax.f32 %v2118_v40, %v699_v28 }
 0x4ab   : > { %v762_v46 = vrot.slane %v761_v37, 4 }
 0x4ac   : > { %v743_v5 = vsel %vm292_vm1, %v727_v58, 1e+30  ;;  %v742_v36 = vsel %vm291_vm2, %v726_v32, 1e+30 }
 0x4ad   : > { %v705_v38 = vpop.permute.xlu1 %704  ;;  %v703_v17 = vpop.permute.xlu0 %702  ;;  %v768_v18 = vmin.f32 %v742_v36, %v743_v5  ;;  %v763_v1 = vmin.f32 %v761_v37, %v762_v46 }
 0x4ae   : > { %v729_v39 = vmax.f32 %v2124_v35, %v705_v38  ;;  %v728_v40 = vmax.f32 %v2126_v44, %v703_v17 }
 0x4af   : > { %v769_v54 = vrot.slane %v768_v18, 4  ;;  %v764_v14 = vrot.slane %v763_v1, 2 }
 0x4b0   : > { %v745_v34 = vsel %vm292_vm1, %v729_v39, 1e+30  ;;  %v744_v45 = vsel %vm291_vm2, %v728_v40, 1e+30 }
 0x4b1   : > { %v775_v49 = vmin.f32 %v744_v45, %v745_v34  ;;  %v709_v50 = vpop.permute.xlu1 %708  ;;  %v707_v53 = vpop.permute.xlu0 %706  ;;  %v770_v8 = vmin.f32 %v768_v18, %v769_v54  ;;  %v765_v33 = vmin.f32 %v763_v1, %v764_v14 }
 0x4b2   : > { %v731_v59 = vmax.f32 %v2132_v47, %v709_v50  ;;  %v730_v60 = vmax.f32 %v2134_v48, %v707_v53  ;;  %v756_v47 = vmin.f32 %v754_v41, %v755_v61 }
 0x4b3   : > { %v776_v35 = vrot.slane %v775_v49, 4  ;;  %v771_v26 = vrot.slane %v770_v8, 2 }
 0x4b4   : > { %v747_v44 = vsel %vm292_vm1, %v731_v59, 1e+30  ;;  %v746_v0 = vsel %vm291_vm2, %v730_v60, 1e+30 }
 0x4b5   : > { %v782_v2 = vmin.f32 %v746_v0, %v747_v44  ;;  %v713_v3 = vpop.permute.xlu1 %712  ;;  %v711_v7 = vpop.permute.xlu0 %710  ;;  %v777_v11 = vmin.f32 %v775_v49, %v776_v35  ;;  %v772_v17 = vmin.f32 %v770_v8, %v771_v26  ;;  %v766_v49 = vrot.slane %v765_v33, 1 }
 0x4b6   : > { %v733_v9 = vmax.f32 %v2140_v51, %v713_v3  ;;  %v732_v10 = vmax.f32 %v2142_v52, %v711_v7  ;;  %v757_v52 = vrot.slane %v756_v47, 2 }
 0x4b7   : > { %v783_v48 = vrot.slane %v782_v2, 4  ;;  %v778_v30 = vrot.slane %v777_v11, 2  ;;  %v773_v59 = vrot.slane %v772_v17, 1  ;;  %v767_v44 = vmin.f32 %v765_v33, %v766_v49 }
 0x4b8   : > { %v749_v12 = vsel %vm292_vm1, %v733_v9, 1e+30  ;;  %v748_v13 = vsel %vm291_vm2, %v732_v10, 1e+30  ;;  %v758_v18 = vmin.f32 %v756_v47, %v757_v52 }
 0x4b9   : > { %v784_v16 = vmin.f32 %v782_v2, %v783_v48  ;;  %v789_v20 = vmin.f32 %v748_v13, %v749_v12  ;;  %v717_v22 = vpop.permute.xlu1 %716  ;;  %v715_v24 = vpop.permute.xlu0 %714  ;;  %v779_v39 = vmin.f32 %v777_v11, %v778_v30  ;;  %v774_v42 = vmin.f32 %v772_v17, %v773_v59 }
 0x4ba   : > { %v735_v28 = vmax.f32 %v2148_v55, %v717_v22  ;;  %v734_v51 = vmax.f32 %v2150_v56, %v715_v24  ;;  %v759_v60 = vrot.slane %v758_v18, 1 }
 0x4bb   : > { %v790_v57 = vrot.slane %v789_v20, 4  ;;  %v785_v58 = vrot.slane %v784_v16, 2 }
 0x4bc   : > { %v751_v32 = vsel %vm292_vm1, %v735_v28, 1e+30  ;;  %v750_v6 = vsel %vm291_vm2, %v734_v51, 1e+30  ;;  %v760_v3 = vmin.f32 %v758_v18, %v759_v60  ;;  %v834_v18 = vld [vmem:[%s2488_s1] sm:$0x3] }
 0x4bd   : > { %v791_v5 = vmin.f32 %v789_v20, %v790_v57  ;;  %v796_v36 = vmin.f32 %v750_v6, %v751_v32  ;;  %v721_v37 = vpop.permute.xlu1 %720  ;;  %v719_v38 = vpop.permute.xlu0 %718  ;;  %v786_v34 = vmin.f32 %v784_v16, %v785_v58 }
 0x4be   : > { %v737_v55 = vmax.f32 %v2158_v62, %v721_v37  ;;  %v736_v56 = vmax.f32 %v2160_v63, %v719_v38  ;;  %v780_v62 = vrot.slane %v779_v39, 1  ;;  %v819_v10 = vsel %vm818_vm3, %v767_v44, %v760_v3 }
 0x4bf   : > { %v792_v40 = vrot.slane %v791_v5, 2  ;;  %v797_v41 = vrot.slane %v796_v36, 4  ;;  %v787_v35 = vrot.slane %v786_v34, 1  ;;  %v821_v48 = vsel %vm820_vm4, %v774_v42, %v819_v10 }
 0x4c0   : > { %v753_v45 = vsel %vm292_vm1, %v737_v55, 1e+30  ;;  %v752_v46 = vsel %vm291_vm2, %v736_v56, 1e+30  ;;  %v781_v43 = vmin.f32 %v779_v39, %v780_v62 }
 0x4c1   : > { %v793_v50 = vmin.f32 %v791_v5, %v792_v40  ;;  %v798_v53 = vmin.f32 %v796_v36, %v797_v41  ;;  %v803_v54 = vmin.f32 %v752_v46, %v753_v45  ;;  %v788_v9 = vmin.f32 %v786_v34, %v787_v35  ;;  %v857_v6 = vpop.permute.xlu1 %856  ;;  %v1196_v45 = vld [vmem:[%s2489_s2] sm:$0x3] }
 0x4c2   : > { %v823_v13 = vsel %vm822_vm5, %v781_v43, %v821_v48  ;;  %v2262_v41 = vrot.slane %v834_v18, %v1934_v19  ;;  %v2265_v34 = vrot.slane %v834_v18, %v1928_v15 }
 0x4c3   : > { %v799_v61 = vrot.slane %v798_v53, 2  ;;  %v804_v63 = vrot.slane %v803_v54, 4  ;;  %v794_v0 = vrot.slane %v793_v50, 1  ;;  %v825_v16 = vsel %vm824_vm6, %v788_v9, %v823_v13 }
 0x4c4   : > { %vm938_vm10 = vcmp.eq.s32.totalorder %v857_v6, %v2265_v34  ;;  %vm939_vm11 = vcmp.eq.s32.totalorder %v857_v6, %v2262_v41 }
 0x4c5   : > { %v800_v1 = vmin.f32 %v798_v53, %v799_v61  ;;  %v805_v2 = vmin.f32 %v803_v54, %v804_v63  ;;  %v795_v47 = vmin.f32 %v793_v50, %v794_v0  ;;  %v868_v33 = vpop.permute.xlu1 %867  ;;  %v2275_v61 = vrot.slane %v1196_v45, %v1928_v15 }
 0x4c6   : > { %v2278_v63 = vrot.slane %v1196_v45, %v1934_v19  ;;  %vm942_vm14 = vcmp.eq.s32.totalorder %v868_v33, %v2265_v34  ;;  %vm943_vm15 = vcmp.eq.s32.totalorder %v868_v33, %v2262_v41 }
 0x4c7   : > { %v801_v7 = vrot.slane %v800_v1, 1  ;;  %v806_v8 = vrot.slane %v805_v2, 2  ;;  %v827_v20 = vsel %vm826_vm7, %v795_v47, %v825_v16 }
 0x4c9   : > { %v807_v11 = vmin.f32 %v805_v2, %v806_v8  ;;  %v802_v12 = vmin.f32 %v800_v1, %v801_v7  ;;  %v846_v36 = vpop.permute.xlu1 %845 }
 0x4ca   : > { %vm934_vm2 = vcmp.eq.s32.totalorder %v846_v36, %v2265_v34 }
 0x4cb   : > { %v808_v14 = vrot.slane %v807_v11, 1  ;;  %v829_v24 = vsel %vm828_vm8, %v802_v12, %v827_v20 }
 0x4cd   : > { %v809_v22 = vmin.f32 %v807_v11, %v808_v14  ;;  %v2238_v37 = vpop.permute.xlu1 %878 }
 0x4cf   : > { %v831_v26 = vsel %vm2498_vm9, %v809_v22, %v829_v24 }
 0x4d0   : > { %v833_v28 = vsub.f32 %v1925_v4, %v831_v26 }
 0x4d2   : > { %v978_v51 = vrot.slane %v833_v28, %v1934_v19  ;;  %v989_v52 = vrot.slane %v833_v28, %v1937_v21  ;;  %v967_v30 = vrot.slane %v833_v28, %v1928_v15  ;;  %v1000_v57 = vrot.slane %v833_v28, %v1940_v23  ;;  %v853_v23 = vpop.permute.xlu0 %852 }
 0x4d3   : > { %v1011_v58 = vrot.slane %v833_v28, %v1943_v25  ;;  %v1022_v4 = vrot.slane %v833_v28, %v1946_v27  ;;  %v1033_v21 = vrot.slane %v833_v28, %v1949_v29  ;;  %v1044_v32 = vrot.slane %v833_v28, %v1952_v31  ;;  %v2242_v27 = vpop.permute.xlu1 %889 }
 0x4d4   : > { %984 = vbcast.lane.b32.xlu1 %v978_v51, 264  ;;  %980 = vbcast.lane.b32.xlu0 %v978_v51, 256  ;;  %vm936_vm12 = vcmp.eq.s32.totalorder %v853_v23, %v2265_v34  ;;  %vm937_vm13 = vcmp.eq.s32.totalorder %v853_v23, %v2262_v41 }
 0x4d6   : > { %v864_v5 = vpop.permute.xlu0 %863 }
 0x4d7   : > { %v2246_v29 = vpop.permute.xlu1 %900  ;;  %vm940_vm0 = vcmp.eq.s32.totalorder %v864_v5, %v2265_v34  ;;  %vm941_vm1 = vcmp.eq.s32.totalorder %v864_v5, %v2262_v41 }
 0x4d8   : > { %995 = vbcast.lane.b32.xlu1 %v989_v52, 264  ;;  %991 = vbcast.lane.b32.xlu0 %v989_v52, 256 }
 0x4da   : > { %v842_v25 = vpop.permute.xlu0 %841 }
 0x4db   : > { %v2250_v31 = vpop.permute.xlu1 %911 }
 0x4dc   : > { %973 = vbcast.lane.b32.xlu1 %v967_v30, 264  ;;  %969 = vbcast.lane.b32.xlu0 %v967_v30, 256  ;;  %vm959_vm9 = vcmp.eq.s32.totalorder %v2250_v31, %v2262_v41 }
 0x4de   : > { %v2240_v38 = vpop.permute.xlu0 %874 }
 0x4df   : > { %v2257_v39 = vpop.permute.xlu1 %922 }
 0x4e0   : > { %1006 = vbcast.lane.b32.xlu1 %v1000_v57, 264  ;;  %1002 = vbcast.lane.b32.xlu0 %v1000_v57, 256 }
 0x4e2   : > { %v2244_v17 = vpop.permute.xlu0 %885 }
 0x4e4   : > { %1017 = vbcast.lane.b32.xlu1 %v1011_v58, 264  ;;  %1013 = vbcast.lane.b32.xlu0 %v1011_v58, 256 }
 0x4e6   : > { %v2248_v55 = vpop.permute.xlu0 %896 }
 0x4e8   : > { %1028 = vbcast.lane.b32.xlu1 %v1022_v4, 264  ;;  %1024 = vbcast.lane.b32.xlu0 %v1022_v4, 256 }
 0x4ea   : > { %v2252_v56 = vpop.permute.xlu0 %907 }
 0x4ec   : > { %1039 = vbcast.lane.b32.xlu1 %v1033_v21, 264  ;;  %1035 = vbcast.lane.b32.xlu0 %v1033_v21, 256 }
 0x4ee   : > { %v2259_v40 = vpop.permute.xlu0 %918 }
 0x4f0   : > { %1050 = vbcast.lane.b32.xlu1 %v1044_v32, 264  ;;  %1046 = vbcast.lane.b32.xlu0 %v1044_v32, 256 }
 0x546   : > { %v985_v46 = vpop.permute.xlu1 %984  ;;  %v981_v49 = vpop.permute.xlu0 %980 }
 0x547   : > { %v1058_v50 = vsel %vm938_vm10, %v985_v46, 0.0  ;;  %v1059_v53 = vsel %vm939_vm11, %v985_v46, 0.0  ;;  %v1056_v54 = vsel %vm936_vm12, %v981_v49, 0.0  ;;  %v1057_v59 = vsel %vm937_vm13, %v981_v49, 0.0 }
 0x548   : > { %v1098_v60 = vadd.f32 %v1058_v50, %v1056_v54  ;;  %v1105_v62 = vadd.f32 %v1059_v53, %v1057_v59  ;;  %vm935_vm10 = vcmp.eq.s32.totalorder %v846_v36, %v2262_v41  ;;  %vm932_vm11 = vcmp.eq.s32.totalorder %v842_v25, %v2265_v34 }
 0x549   : > { %vm933_vm12 = vcmp.eq.s32.totalorder %v842_v25, %v2262_v41  ;;  %vm946_vm13 = vcmp.eq.s32.totalorder %v2238_v37, %v2265_v34 }
 0x54a   : > { %v1099_v35 = vrot.slane %v1098_v60, 4  ;;  %v1106_v44 = vrot.slane %v1105_v62, 4  ;;  %v996_v0 = vpop.permute.xlu1 %995  ;;  %v992_v1 = vpop.permute.xlu0 %991 }
 0x54b   : > { %v1062_v2 = vsel %vm942_vm14, %v996_v0, 0.0  ;;  %v1063_v42 = vsel %vm943_vm15, %v996_v0, 0.0  ;;  %v1060_v3 = vsel %vm940_vm0, %v992_v1, 0.0  ;;  %v1061_v15 = vsel %vm941_vm1, %v992_v1, 0.0 }
 0x54c   : > { %v1100_v43 = vadd.f32 %v1099_v35, %v1098_v60  ;;  %v1107_v7 = vadd.f32 %v1106_v44, %v1105_v62  ;;  %v1112_v19 = vadd.f32 %v1062_v2, %v1060_v3  ;;  %v1119_v8 = vadd.f32 %v1063_v42, %v1061_v15 }
 0x54d   : > { %vm947_vm14 = vcmp.eq.s32.totalorder %v2238_v37, %v2262_v41  ;;  %vm944_vm15 = vcmp.eq.s32.totalorder %v2240_v38, %v2265_v34  ;;  %vm945_vm0 = vcmp.eq.s32.totalorder %v2240_v38, %v2262_v41  ;;  %vm950_vm1 = vcmp.eq.s32.totalorder %v2242_v27, %v2265_v34 }
 0x54e   : > { %v1101_v9 = vrot.slane %v1100_v43, 2  ;;  %v1108_v10 = vrot.slane %v1107_v7, 2  ;;  %v1113_v47 = vrot.slane %v1112_v19, 4  ;;  %v1120_v11 = vrot.slane %v1119_v8, 4  ;;  %v974_v48 = vpop.permute.xlu1 %973  ;;  %v970_v12 = vpop.permute.xlu0 %969 }
 0x54f   : > { %v1054_v13 = vsel %vm934_vm2, %v974_v48, 0.0  ;;  %v1055_v14 = vsel %vm935_vm10, %v974_v48, 0.0  ;;  %v1052_v16 = vsel %vm932_vm11, %v970_v12, 0.0  ;;  %v1053_v20 = vsel %vm933_vm12, %v970_v12, 0.0 }
 0x550   : > { %v1102_v22 = vadd.f32 %v1101_v9, %v1100_v43  ;;  %v1109_v24 = vadd.f32 %v1108_v10, %v1107_v7  ;;  %v1114_v26 = vadd.f32 %v1113_v47, %v1112_v19  ;;  %v1121_v28 = vadd.f32 %v1120_v11, %v1119_v8 }
 0x551   : > { %v1084_v51 = vadd.f32 %v1054_v13, %v1052_v16  ;;  %v1091_v52 = vadd.f32 %v1055_v14, %v1053_v20  ;;  %vm951_vm2 = vcmp.eq.s32.totalorder %v2242_v27, %v2262_v41  ;;  %vm948_vm10 = vcmp.eq.s32.totalorder %v2244_v17, %v2265_v34 }
 0x552   : > { %v1103_v30 = vrot.slane %v1102_v22, 1  ;;  %v1110_v57 = vrot.slane %v1109_v24, 1  ;;  %v1115_v58 = vrot.slane %v1114_v26, 2  ;;  %v1122_v4 = vrot.slane %v1121_v28, 2  ;;  %v1007_v21 = vpop.permute.xlu1 %1006  ;;  %v1003_v32 = vpop.permute.xlu0 %1002 }
 0x553   : > { %v1085_v6 = vrot.slane %v1084_v51, 4  ;;  %v1092_v23 = vrot.slane %v1091_v52, 4  ;;  %v1066_v36 = vsel %vm946_vm13, %v1007_v21, 0.0  ;;  %v1067_v25 = vsel %vm947_vm14, %v1007_v21, 0.0 }
 0x554   : > { %v1104_v33 = vadd.f32 %v1103_v30, %v1102_v22  ;;  %v1111_v5 = vadd.f32 %v1110_v57, %v1109_v24  ;;  %v1064_v18 = vsel %vm944_vm15, %v1003_v32, 0.0  ;;  %v1065_v45 = vsel %vm945_vm0, %v1003_v32, 0.0 }
 0x555   : > { %v1116_v46 = vadd.f32 %v1115_v58, %v1114_v26  ;;  %v1123_v49 = vadd.f32 %v1122_v4, %v1121_v28  ;;  %v1086_v50 = vadd.f32 %v1085_v6, %v1084_v51  ;;  %v1093_v53 = vadd.f32 %v1092_v23, %v1091_v52 }
 0x556   : > { %v1126_v54 = vadd.f32 %v1066_v36, %v1064_v18  ;;  %v1133_v38 = vadd.f32 %v1067_v25, %v1065_v45  ;;  %v1210_v59 = vsub.f32 %v1104_v33, %v2275_v61  ;;  %v1211_v60 = vsub.f32 %v1111_v5, %v2278_v63  ;;  %v1018_v3 = vpop.permute.xlu1 %1017  ;;  %v1014_v7 = vpop.permute.xlu0 %1013 }
 0x557   : > { %v1117_v44 = vrot.slane %v1116_v46, 1  ;;  %v1124_v0 = vrot.slane %v1123_v49, 1  ;;  %v1087_v1 = vrot.slane %v1086_v50, 2  ;;  %v1094_v2 = vrot.slane %v1093_v53, 2 }
 0x558   : > { %v1127_v62 = vrot.slane %v1126_v54, 4  ;;  %v1134_v35 = vrot.slane %v1133_v38, 4  ;;  %v1226_v37 = vand.u32 2147483647, %v1210_v59  ;;  %v1227_v42 = vand.u32 2147483647, %v1211_v60 }
 0x559   : > { %vm949_vm11 = vcmp.eq.s32.totalorder %v2244_v17, %v2262_v41  ;;  %vm954_vm12 = vcmp.eq.s32.totalorder %v2246_v29, %v2265_v34  ;;  %vm955_vm13 = vcmp.eq.s32.totalorder %v2246_v29, %v2262_v41  ;;  %v1118_v19 = vadd.f32 %v1117_v44, %v1116_v46 }
 0x55a   : > { %v1128_v15 = vadd.f32 %v1127_v62, %v1126_v54  ;;  %v1135_v43 = vadd.f32 %v1134_v35, %v1133_v38  ;;  %v1125_v8 = vadd.f32 %v1124_v0, %v1123_v49  ;;  %v1088_v9 = vadd.f32 %v1087_v1, %v1086_v50  ;;  %v1029_v22 = vpop.permute.xlu1 %1028  ;;  %v1025_v51 = vpop.permute.xlu0 %1024 }
 0x55b   : > { %v1095_v10 = vadd.f32 %v1094_v2, %v1093_v53  ;;  %vm952_vm14 = vcmp.eq.s32.totalorder %v2248_v55, %v2265_v34  ;;  %vm953_vm15 = vcmp.eq.s32.totalorder %v2248_v55, %v2262_v41  ;;  %v1242_v47 = vsub.f32 1.0, %v1226_v37 }
 0x55c   : > { %v1243_v11 = vsub.f32 1.0, %v1227_v42  ;;  %v1129_v48 = vrot.slane %v1128_v15, 2  ;;  %v1136_v12 = vrot.slane %v1135_v43, 2  ;;  %v1070_v13 = vsel %vm950_vm1, %v1018_v3, 0.0 }
 0x55d   : > { %v1071_v14 = vsel %vm951_vm2, %v1018_v3, 0.0  ;;  %vm958_vm0 = vcmp.eq.s32.totalorder %v2250_v31, %v2265_v34  ;;  %v1068_v16 = vsel %vm948_vm10, %v1014_v7, 0.0  ;;  %v1069_v20 = vsel %vm949_vm11, %v1014_v7, 0.0 }
 0x55e   : > { %v1212_v24 = vsub.f32 %v1118_v19, %v2275_v61  ;;  %v1213_v27 = vsub.f32 %v1125_v8, %v2278_v63  ;;  %v1089_v26 = vrot.slane %v1088_v9, 1  ;;  %v1096_v28 = vrot.slane %v1095_v10, 1  ;;  %v1040_v49 = vpop.permute.xlu1 %1039  ;;  %v1036_v38 = vpop.permute.xlu0 %1035 }
 0x55f   : > { %v2338_v52 = vmax.f32 %v1242_v47, 0.0  ;;  %v2340_v30 = vmax.f32 %v1243_v11, 0.0  ;;  %v1140_v57 = vadd.f32 %v1070_v13, %v1068_v16  ;;  %v1147_v58 = vadd.f32 %v1071_v14, %v1069_v20 }
 0x560   : > { %v1130_v4 = vadd.f32 %v1129_v48, %v1128_v15  ;;  %v1137_v21 = vadd.f32 %v1136_v12, %v1135_v43  ;;  %v1074_v17 = vsel %vm954_vm12, %v1029_v22, 0.0  ;;  %v1075_v32 = vsel %vm955_vm13, %v1029_v22, 0.0 }
 0x561   : > { %v1141_v6 = vrot.slane %v1140_v57, 4  ;;  %v1148_v23 = vrot.slane %v1147_v58, 4  ;;  %v1072_v33 = vsel %vm952_vm14, %v1025_v51, 0.0  ;;  %v1073_v5 = vsel %vm953_vm15, %v1025_v51, 0.0 }
 0x562   : > { %vm956_vm1 = vcmp.eq.s32.totalorder %v2252_v56, %v2265_v34  ;;  %vm957_vm2 = vcmp.eq.s32.totalorder %v2252_v56, %v2262_v41  ;;  %v2358_v36 = vand.u32 2147483647, %v1212_v24  ;;  %v2360_v29 = vand.u32 2147483647, %v1213_v27  ;;  %v1051_v56 = vpop.permute.xlu1 %1050  ;;  %v1047_v24 = vpop.permute.xlu0 %1046 }
 0x563   : > { %v2362_v25 = vadd.f32 %v1089_v26, %v1088_v9  ;;  %v2364_v18 = vadd.f32 %v1096_v28, %v1095_v10  ;;  %v1142_v45 = vadd.f32 %v1141_v6, %v1140_v57  ;;  %v1149_v46 = vadd.f32 %v1148_v23, %v1147_v58 }
 0x564   : > { %v1288_v55 = vrot.slane %v2338_v52, 7  ;;  %v1302_v50 = vrot.slane %v2340_v30, 7  ;;  %v1154_v53 = vadd.f32 %v1074_v17, %v1072_v33  ;;  %v1161_v54 = vadd.f32 %v1075_v32, %v1073_v5 }
 0x565   : > { %vm962_vm10 = vcmp.eq.s32.totalorder %v2257_v39, %v2265_v34  ;;  %vm963_vm11 = vcmp.eq.s32.totalorder %v2257_v39, %v2262_v41  ;;  %v1131_v59 = vrot.slane %v1130_v4, 1  ;;  %v1138_v60 = vrot.slane %v1137_v21, 1 }
 0x566   : > { %v1143_v62 = vrot.slane %v1142_v45, 2  ;;  %v1150_v35 = vrot.slane %v1149_v46, 2  ;;  %vm960_vm12 = vcmp.eq.s32.totalorder %v2259_v40, %v2265_v34  ;;  %vm961_vm13 = vcmp.eq.s32.totalorder %v2259_v40, %v2262_v41 }
 0x567   : > { %v1155_v44 = vrot.slane %v1154_v53, 4  ;;  %v1162_v0 = vrot.slane %v1161_v54, 4  ;;  %v1078_v1 = vsel %vm958_vm0, %v1040_v49, 0.0  ;;  %v1079_v2 = vsel %vm959_vm9, %v1040_v49, 0.0 }
 0x568   : > { %v1144_v37 = vadd.f32 %v1143_v62, %v1142_v45  ;;  %v1151_v42 = vadd.f32 %v1150_v35, %v1149_v46  ;;  %v1076_v3 = vsel %vm956_vm1, %v1036_v38, 0.0  ;;  %v1077_v15 = vsel %vm957_vm2, %v1036_v38, 0.0 }
 0x569   : > { %v1244_v43 = vsub.f32 1.0, %v2358_v36  ;;  %v1245_v7 = vsub.f32 1.0, %v2360_v29  ;;  %v1156_v19 = vadd.f32 %v1155_v44, %v1154_v53  ;;  %v1163_v8 = vadd.f32 %v1162_v0, %v1161_v54 }
 0x56a   : > { %v1145_v9 = vrot.slane %v1144_v37, 1  ;;  %v1152_v10 = vrot.slane %v1151_v42, 1  ;;  %v1168_v31 = vadd.f32 %v1078_v1, %v1076_v3  ;;  %v1175_v47 = vadd.f32 %v1079_v2, %v1077_v15 }
 0x56b   : > { %v1208_v11 = vsub.f32 %v2362_v25, %v2275_v61  ;;  %v1209_v48 = vsub.f32 %v2364_v18, %v2278_v63  ;;  %v1157_v12 = vrot.slane %v1156_v19, 2  ;;  %v1164_v13 = vrot.slane %v1163_v8, 2 }
 0x56c   : > { %v1132_v14 = vadd.f32 %v1131_v59, %v1130_v4  ;;  %v1139_v16 = vadd.f32 %v1138_v60, %v1137_v21  ;;  %v1169_v20 = vrot.slane %v1168_v31, 4  ;;  %v1176_v22 = vrot.slane %v1175_v47, 4 }
 0x56d   : > { %v1146_v27 = vadd.f32 %v1145_v9, %v1144_v37  ;;  %v1153_v26 = vadd.f32 %v1152_v10, %v1151_v42  ;;  %v1158_v28 = vadd.f32 %v1157_v12, %v1156_v19  ;;  %v1165_v51 = vadd.f32 %v1164_v13, %v1163_v8 }
 0x56e   : > { %v1170_v57 = vadd.f32 %v1169_v20, %v1168_v31  ;;  %v1177_v58 = vadd.f32 %v1176_v22, %v1175_v47  ;;  %v1082_v17 = vsel %vm962_vm10, %v1051_v56, 0.0  ;;  %v1083_v32 = vsel %vm963_vm11, %v1051_v56, 0.0 }
 0x56f   : > { %v1159_v6 = vrot.slane %v1158_v28, 1  ;;  %v1166_v4 = vrot.slane %v1165_v51, 1  ;;  %v1080_v21 = vsel %vm960_vm12, %v1047_v24, 0.0  ;;  %v1081_v23 = vsel %vm961_vm13, %v1047_v24, 0.0 }
 0x570   : > { %v1214_v33 = vsub.f32 %v1132_v14, %v2275_v61  ;;  %v1215_v5 = vsub.f32 %v1139_v16, %v2278_v63  ;;  %v1171_v25 = vrot.slane %v1170_v57, 2  ;;  %v1178_v18 = vrot.slane %v1177_v58, 2 }
 0x571   : > { %v1160_v45 = vadd.f32 %v1159_v6, %v1158_v28  ;;  %v1167_v46 = vadd.f32 %v1166_v4, %v1165_v51  ;;  %v1182_v39 = vadd.f32 %v1082_v17, %v1080_v21  ;;  %v1189_v49 = vadd.f32 %v1083_v32, %v1081_v23 }
 0x572   : > { %v1216_v53 = vsub.f32 %v1146_v27, %v2275_v61  ;;  %v1217_v54 = vsub.f32 %v1153_v26, %v2278_v63  ;;  %v1172_v34 = vadd.f32 %v1171_v25, %v1170_v57  ;;  %v1179_v38 = vadd.f32 %v1178_v18, %v1177_v58 }
 0x573   : > { %v1218_v59 = vsub.f32 %v1160_v45, %v2275_v61  ;;  %v1219_v40 = vsub.f32 %v1167_v46, %v2278_v63  ;;  %v1183_v41 = vrot.slane %v1182_v39, 4  ;;  %v1190_v60 = vrot.slane %v1189_v49, 4 }
 0x574   : > { %v1224_v62 = vand.u32 2147483647, %v1208_v11  ;;  %v1225_v35 = vand.u32 2147483647, %v1209_v48  ;;  %v1173_v44 = vrot.slane %v1172_v34, 1  ;;  %v1180_v0 = vrot.slane %v1179_v38, 1 }
 0x575   : > { %v1230_v1 = vand.u32 2147483647, %v1214_v33  ;;  %v1231_v2 = vand.u32 2147483647, %v1215_v5  ;;  %v1184_v37 = vadd.f32 %v1183_v41, %v1182_v39  ;;  %v1191_v42 = vadd.f32 %v1190_v60, %v1189_v49 }
 0x576   : > { %v1232_v3 = vand.u32 2147483647, %v1216_v53  ;;  %v1233_v15 = vand.u32 2147483647, %v1217_v54  ;;  %v1174_v19 = vadd.f32 %v1173_v44, %v1172_v34  ;;  %v1181_v8 = vadd.f32 %v1180_v0, %v1179_v38 }
 0x577   : > { %v1234_v9 = vand.u32 2147483647, %v1218_v59  ;;  %v1235_v10 = vand.u32 2147483647, %v1219_v40  ;;  %v1185_v31 = vrot.slane %v1184_v37, 2  ;;  %v1192_v47 = vrot.slane %v1191_v42, 2 }
 0x578   : > { %v1240_v12 = vsub.f32 1.0, %v1224_v62  ;;  %v1241_v13 = vsub.f32 1.0, %v1225_v35  ;;  %v1220_v56 = vsub.f32 %v1174_v19, %v2275_v61  ;;  %v1221_v11 = vsub.f32 %v1181_v8, %v2278_v63 }
 0x579   : > { %v1246_v48 = vsub.f32 1.0, %v1230_v1  ;;  %v1247_v14 = vsub.f32 1.0, %v1231_v2  ;;  %v1186_v16 = vadd.f32 %v1185_v31, %v1184_v37  ;;  %v1193_v20 = vadd.f32 %v1192_v47, %v1191_v42 }
 0x57a   : > { %v1248_v22 = vsub.f32 1.0, %v1232_v3  ;;  %v1249_v24 = vsub.f32 1.0, %v1233_v15  ;;  %v1236_v27 = vand.u32 2147483647, %v1220_v56  ;;  %v1237_v26 = vand.u32 2147483647, %v1221_v11 }
 0x57b   : > { %v1250_v28 = vsub.f32 1.0, %v1234_v9  ;;  %v1251_v51 = vsub.f32 1.0, %v1235_v10  ;;  %v1187_v57 = vrot.slane %v1186_v16, 1  ;;  %v1194_v58 = vrot.slane %v1193_v20, 1 }
 0x57c   : > { %v1256_v17 = vmax.f32 %v1240_v12, 0.0  ;;  %v1257_v32 = vmax.f32 %v1241_v13, 0.0  ;;  %v1252_v6 = vsub.f32 1.0, %v1236_v27  ;;  %v1253_v4 = vsub.f32 1.0, %v1237_v26 }
 0x57d   : > { %v1262_v21 = vmax.f32 %v1246_v48, 0.0  ;;  %v1263_v23 = vmax.f32 %v1247_v14, 0.0  ;;  %v1188_v33 = vadd.f32 %v1187_v57, %v1186_v16  ;;  %v1195_v5 = vadd.f32 %v1194_v58, %v1193_v20 }
 0x57e   : > { %v1260_v25 = vmax.f32 %v1244_v43, 0.0  ;;  %v1261_v18 = vmax.f32 %v1245_v7, 0.0  ;;  %v1264_v45 = vmax.f32 %v1248_v22, 0.0  ;;  %v1265_v46 = vmax.f32 %v1249_v24, 0.0 }
 0x57f   : > { %v1266_v39 = vmax.f32 %v1250_v28, 0.0  ;;  %v1267_v49 = vmax.f32 %v1251_v51, 0.0  ;;  %v1222_v53 = vsub.f32 %v1188_v33, %v2275_v61  ;;  %v1223_v54 = vsub.f32 %v1195_v5, %v2278_v63 }
 0x580   : > { %v1289_v34 = vsel %vm818_vm3, %v1288_v55, %v1256_v17  ;;  %v1303_v36 = vsel %vm818_vm3, %v1302_v50, %v1257_v32  ;;  %v1268_v43 = vmax.f32 %v1252_v6, 0.0  ;;  %v1269_v29 = vmax.f32 %v1253_v4, 0.0 }
 0x581   : > { %v1292_v7 = vrot.slane %v1262_v21, 5  ;;  %v1306_v38 = vrot.slane %v1263_v23, 5  ;;  %v1238_v59 = vand.u32 2147483647, %v1222_v53  ;;  %v1239_v40 = vand.u32 2147483647, %v1223_v54 }
 0x582   : > { %v1290_v41 = vrot.slane %v1260_v25, 6  ;;  %v1304_v61 = vrot.slane %v1261_v18, 6  ;;  %v1294_v60 = vrot.slane %v1264_v45, 4  ;;  %v1308_v63 = vrot.slane %v1265_v46, 4 }
 0x583   : > { %v1296_v62 = vrot.slane %v1266_v39, 3  ;;  %v1310_v35 = vrot.slane %v1267_v49, 3  ;;  %v1254_v52 = vsub.f32 1.0, %v1238_v59  ;;  %v1255_v44 = vsub.f32 1.0, %v1239_v40 }
 0x584   : > { %v1291_v55 = vsel %vm820_vm4, %v1290_v41, %v1289_v34  ;;  %v1305_v30 = vsel %vm820_vm4, %v1304_v61, %v1303_v36  ;;  %v1298_v50 = vrot.slane %v1268_v43, 2  ;;  %v1312_v0 = vrot.slane %v1269_v29, 2 }
 0x585   : > { %v1293_v1 = vsel %vm822_vm5, %v1292_v7, %v1291_v55  ;;  %v1307_v2 = vsel %vm822_vm5, %v1306_v38, %v1305_v30  ;;  %v1270_v37 = vmax.f32 %v1254_v52, 0.0  ;;  %v1271_v42 = vmax.f32 %v1255_v44, 0.0 }
 0x586   : > { %v1295_v3 = vsel %vm824_vm6, %v1294_v60, %v1293_v1  ;;  %v1309_v15 = vsel %vm824_vm6, %v1308_v63, %v1307_v2  ;;  %vm2512_vm3 = vcmask 1047559  }
 0x587   : > { %v1300_v19 = vrot.slane %v1270_v37, 1  ;;  %v1314_v8 = vrot.slane %v1271_v42, 1  ;;  %v1297_v9 = vsel %vm826_vm7, %v1296_v62, %v1295_v3  ;;  %v1311_v10 = vsel %vm826_vm7, %v1310_v35, %v1309_v15  ;;  %vm2513_vm4 = vmmov %vm2512_vm3 }
 0x588   : > { %v1299_v31 = vsel %vm828_vm8, %v1298_v50, %v1297_v9  ;;  %v1313_v47 = vsel %vm828_vm8, %v1312_v0, %v1311_v10 }
 0x589   : > { %v1301_v12 = vsel %vm2512_vm3, %v1300_v19, %v1299_v31  ;;  %v1315_v13 = vsel %vm2513_vm4, %v1314_v8, %v1313_v47 }
 0x58a   : > { %1318 = vst [vmem:[%s288_s14] sm:$0xff] %v1301_v12  ;;  %1319 = vst [vmem:[%s288_s14 + $0x8] sm:$0xff] %v1315_v13 }
 0x58b   : > { %1630 = shalt.err (!%p1627_p1)
}
 0x58c   : > { %s1631_s6 = scalar_lea.hbm %s2441_s8, 256  ;;  %s1635_s17 = scalar_lea.hbm %s2492_s5, 512 }
 0x58d   : > { %p1632_p5 = scmp.ne.s32.totalorder %s2441_s8, %s1631_s6  ;;  %p1636_p4 = scmp.lt.u32.totalorder %s2441_s8, %s2492_s5 }
 0x58e   : > { %p1637_p7 = scmp.lt.u32.totalorder %s1635_s17, %s1631_s6  ;;  %p1639_p9 = scmp.lt.u32.totalorder %s1631_s6, %s2441_s8 }
 0x58f   : > { %p1633_p11 = pnand %p1632_p5, %p2514_p12 }
 0x590   : > { %p1638_p10 = por %p1637_p7, %p1636_p4 }
 0x591   : > { %p1634_p8 = pneg %p1633_p11 }
 0x592   : > { %p1640_p13 = por %p1639_p9, %p1638_p10 }
 0x594   : > { %p1641_p6 = pnand %p1640_p13, %p1634_p8 }
 0x596   : > { %1644 = shalt.err (!%p1641_p6)
}
 0x597   : > { %1464 = dma.vmem_to_hbm [thread:$0]  (%p2514_p12), %s2443_s12, 256, %s2441_s8, %s1321_s28  }
 0x598 PF: > { %s1347_s26 = sand.u32 1, %s1675_s18   ;;  %p2515_p2 = scmp.ne.s32.totalorder %s2504_s9, 0 }
 0x599   : > { %p2516_p0 = scmp.ge.s32.totalorder %s1687_s21, 2  ;;  %s1348_s27 = scalar_lea.sflag [#allocation4], %s1347_s26 }
 0x59b   : > { %p1478_p3 = pnand %p2516_p0, %p2515_p2 }
 0x59d   : > { %1670 = dma.done.wait (!%p1478_p3), %s1348_s27, 256  }
 0x59e   : > { %1672 = vsyncadd (!%p1478_p3), %s1348_s27, 4294967040  ;;  %p19_p1 = scmp.ge.s32.totalorder %s1755_s22, 4   ;;  %s2517_s18 = smov %s1679_s19 }
 0x59f   : > { %s2518_s19 = smov %s1683_s20  ;;  %s2519_s20 = smov %s1766_s25 }
 0x5a0   : > { %s2520_s21 = smov %s1755_s22  ;;  %21 = sbr.rel (!%p19_p1) target bundleno = 8 (0x8), region = 101 }
 0x5a7   :  { %1353 = vsyncpa [#allocation3], 1 }
 0x5a8   :  { %1355 = vsyncpa [#allocation3 + $0x1], 1 }
 0x5a9   :  { %1356 = vsyncpa [#allocation6], 1 }
 0x5aa   :  { %1358 = vsyncpa [#allocation6 + $0x1], 1 }
 0x5ab   :  { %1359 = vsyncpa [#allocation4], 1 }
 0x5ac   :  { %1361 = vsyncpa [#allocation4 + $0x1], 1 }

</bundles_post_ra>
